<compile_context>
chip_gen: v6e
topology: v6e:2x2x1
jax: 0.10.0
libtpu: 0.0.40
codegen_flags: <defaults>
</compile_context>

<pallas_src>
import functools

import jax
import jax.numpy as jnp
from jax.experimental import pallas as pl
from jax.experimental.pallas import tpu as pltpu


def _round_up(x, m):
    return (x + m - 1) // m * m


def rank_loss_kernel(i_blk_ref, j_blk_ref, valid_ref, si_t_ref, sj_ref,
                     sum_ref, cnt_ref, acc_sum, acc_cnt,
                     *, margin, tile, n_actual, ppc):
    c = pl.program_id(0)          # core-slice index ("parallel" axis)
    p = pl.program_id(1)          # tile-pair index within the core slice
    idx = c * ppc + p             # flat index into the prefetched pair tables

    # Init the per-core-slice accumulators at its first pair.
    @pl.when(p == 0)
    def _():
        acc_sum[...] = jnp.zeros_like(acc_sum)
        acc_cnt[...] = jnp.zeros_like(acc_cnt)

    ib = i_blk_ref[idx]           # row-tile index (scalar, SMEM prefetch)
    jb = j_blk_ref[idx]           # col-tile index
    valid = valid_ref[idx] != 0   # 0 for core-slice padding entries

    # "i" scores arrive pre-transposed (tile, B): the per-batch column is
    # already sublane-major, so broadcasting it along lanes is cheap.
    s_i_t = si_t_ref[...]                    # (tile, B)
    t_j = sj_ref[...] + margin               # (B, tile), margin hoisted

    bsz = t_j.shape[0]
    # Only diagonal tiles and tiles touching the padded tail of N need a mask.
    needs_mask = jnp.logical_or(ib == jb, (jb + 1) * tile > n_actual)

    # Fast path: strictly-upper interior tiles — unmasked, pure VALU.
    @pl.when(jnp.logical_and(valid, jnp.logical_not(needs_mask)))
    def _():
        for b in range(bsz):
            # d[i, j] = margin + s[b, j] - s[b, i]; only (tile, tile) live.
            d_b = t_j[b:b + 1, :] - s_i_t[:, b:b + 1]
            acc_sum[...] += jnp.maximum(d_b, 0.0)
            acc_cnt[...] += (d_b > 0.0).astype(jnp.int32)

    # Masked path: diagonal / padded-boundary tiles.
    @pl.when(jnp.logical_and(valid, needs_mask))
    def _():
        ii = jax.lax.broadcasted_iota(jnp.int32, (tile, tile), 0) + ib * tile
        jj = jax.lax.broadcasted_iota(jnp.int32, (tile, tile), 1) + jb * tile
        keep = jnp.logical_and(jj > ii, jj < n_actual)   # triu(k=1) + bounds
        for b in range(bsz):
            d_b = t_j[b:b + 1, :] - s_i_t[:, b:b + 1]
            acc_sum[...] += jnp.where(keep, jnp.maximum(d_b, 0.0), 0.0)
            acc_cnt[...] += jnp.logical_and(keep, d_b > 0.0).astype(jnp.int32)

    # One deferred cross-lane reduction + writeout per core slice.
    @pl.when(p == pl.num_programs(1) - 1)
    def _():
        sum_ref[...] = jnp.sum(acc_sum[...]).reshape(1, 1)
        cnt_ref[...] = jnp.sum(acc_cnt[...]).reshape(1, 1)


def rank_loss(scores, indices, margin=1.0, tile=512):
    """Pallas implementation of RankLoss.forward(scores, indices)."""
    scores = jnp.asarray(scores, jnp.float32)
    indices = jnp.asarray(indices, jnp.int32)
    B, N = scores.shape

    # O(B*N) gather outside the kernel: exact f32 gather along dim=1.
    sorted_scores = jnp.take_along_axis(scores, indices, axis=1)

    # Tile: multiple of 128, no larger than needed, default 512.
    tile = _round_up(min(tile, _round_up(N, 128)), 128)
    n_pad = _round_up(N, tile)
    if n_pad != N:
        sorted_scores = jnp.pad(sorted_scores, ((0, 0), (0, n_pad - N)))
    sorted_scores_t = sorted_scores.T        # (n_pad, B): sublane-major "i"

    num_blk = n_pad // tile
    # Enumerate only upper-triangular tile pairs (j_tile >= i_tile).
    pairs = [(i, j) for i in range(num_blk) for j in range(i, num_blk)]
    num_pairs = len(pairs)

    # Shard the pair list across (up to) 2 TensorCores (megacore on v7x).
    num_slices = 2 if num_pairs >= 2 else 1
    ppc = -(-num_pairs // num_slices)            # pairs per core slice
    pad = num_slices * ppc - num_pairs
    i_blk = jnp.asarray([pq[0] for pq in pairs] + [0] * pad, jnp.int32)
    j_blk = jnp.asarray([pq[1] for pq in pairs] + [0] * pad, jnp.int32)
    valid = jnp.asarray([1] * num_pairs + [0] * pad, jnp.int32)

    kernel = functools.partial(
        rank_loss_kernel, margin=float(margin), tile=tile, n_actual=N, ppc=ppc)

    grid_spec = pltpu.PrefetchScalarGridSpec(
        num_scalar_prefetch=3,
        grid=(num_slices, ppc),
        in_specs=[
            # "i" slice of the transposed scores and "j" slice of the scores,
            # selected by the prefetched tile-pair tables.
            pl.BlockSpec((tile, B),
                         lambda c, p, ib, jb, vd: (ib[c * ppc + p], 0)),
            pl.BlockSpec((B, tile),
                         lambda c, p, ib, jb, vd: (0, jb[c * ppc + p])),
        ],
        out_specs=(
            pl.BlockSpec((1, 1), lambda c, p, ib, jb, vd: (c, 0)),
            pl.BlockSpec((1, 1), lambda c, p, ib, jb, vd: (c, 0)),
        ),
        scratch_shapes=[
            pltpu.VMEM((tile, tile), jnp.float32),   # hinge-sum accumulator
            pltpu.VMEM((tile, tile), jnp.int32),     # positive-count (exact)
        ],
    )

    s_parts, c_parts = pl.pallas_call(
        kernel,
        grid_spec=grid_spec,
        out_shape=(
            jax.ShapeDtypeStruct((num_slices, 1), jnp.float32),
            jax.ShapeDtypeStruct((num_slices, 1), jnp.int32),
        ),
        compiler_params=pltpu.CompilerParams(
            dimension_semantics=("parallel", "arbitrary"),
            vmem_limit_bytes=32 * 1024 * 1024,
        ),
    )(i_blk, j_blk, valid, sorted_scores_t, sorted_scores)

    s = jnp.sum(s_parts)
    cnt = jnp.sum(c_parts).astype(jnp.float32)
    # if hinge_cnt == 0: return hinge_matrix.sum() (== s); else s / cnt.
    return jnp.where(cnt == 0.0, s, s / jnp.where(cnt == 0.0, 1.0, cnt))


def rank_loss_ref(scores, indices, margin=1.0):
    """Pure-JAX reference matching the PyTorch semantics."""
    scores = jnp.asarray(scores, jnp.float32)
    indices = jnp.asarray(indices, jnp.int32)
    sorted_scores = jnp.take_along_axis(scores, indices, axis=1)
    diff = margin - (sorted_scores[:, :, None] - sorted_scores[:, None, :])
    N = scores.shape[1]
    triu = jnp.triu(jnp.ones((N, N), jnp.bool_), k=1)[None, :, :]
    hinge = jnp.where(triu, jnp.maximum(diff, 0.0), 0.0)
    s = hinge.sum()
    c = jnp.sign(hinge).sum()
    return jnp.where(c == 0.0, s, s / jnp.where(c == 0.0, 1.0, c))


if __name__ == "__main__":
    key = jax.random.PRNGKey(0)
    k1, k2, k3, k4 = jax.random.split(key, 4)

    # --- small shape consistent with the module: batch=2, num_items=8 ---
    B, N = 2, 8
    scores = jax.random.normal(k1, (B, N), dtype=jnp.float32)
    indices = jnp.stack(
        [jax.random.permutation(k, N) for k in jax.random.split(k2, B)], axis=0
    ).astype(jnp.int32)

    loss = jax.block_until_ready(rank_loss(scores, indices, margin=1.0))
    ref = rank_loss_ref(scores, indices, margin=1.0)
    assert jnp.allclose(loss, ref, atol=1e-5, rtol=1e-5), (loss, ref)

    # --- larger, non-multiple-of-tile shape with tile=128: exercises the
    #     triangular tile grid, the 2-way core split, diagonal masking,
    #     boundary (padding) masking and the unmasked fast path ---
    B2, N2 = 4, 300
    scores2 = jax.random.normal(k3, (B2, N2), dtype=jnp.float32)
    indices2 = jnp.stack(
        [jax.random.permutation(k, N2) for k in jax.random.split(k4, B2)], axis=0
    ).astype(jnp.int32)

    loss2 = jax.block_until_ready(rank_loss(scores2, indices2, margin=0.5, tile=128))
    ref2 = rank_loss_ref(scores2, indices2, margin=0.5)
    assert jnp.allclose(loss2, ref2, atol=1e-4, rtol=1e-4), (loss2, ref2)

    # --- same data, default tile: single (diagonal) tile, single core slice ---
    loss3 = jax.block_until_ready(rank_loss(scores2, indices2, margin=1.0))
    ref3 = rank_loss_ref(scores2, indices2, margin=1.0)
    assert jnp.allclose(loss3, ref3, atol=1e-4, rtol=1e-4), (loss3, ref3)

    print("KERNEL_OK")
</pallas_src>

<mosaic_0001>
module attributes {stable_mosaic.version = 11 : i64} {
  func.func @rank_loss_kernel(%arg0: i32, %arg1: i32, %arg2: memref<1xi32, #tpu.memory_space<smem>>, %arg3: memref<1xi32, #tpu.memory_space<smem>>, %arg4: memref<1xi32, #tpu.memory_space<smem>>, %arg5: memref<128x2xf32, #tpu.memory_space<vmem>>, %arg6: memref<2x128xf32, #tpu.memory_space<vmem>>, %arg7: memref<1x1xf32, #tpu.memory_space<vmem>>, %arg8: memref<1x1xi32, #tpu.memory_space<vmem>>, %arg9: memref<128x128xf32, #tpu.memory_space<vmem>>, %arg10: memref<128x128xi32, #tpu.memory_space<vmem>>) attributes {dimension_semantics = [#tpu.dimension_semantics<parallel>, #tpu.dimension_semantics<arbitrary>], iteration_bounds = array<i64: 1, 1>, scalar_prefetch = 3 : i64, scratch_operands = 2 : i64, tpu.core_type = #tpu.core_type<tc>, window_params = [{transform_indices = @transform_0, window_bounds = array<i64: 128, 2>}, {transform_indices = @transform_1, window_bounds = array<i64: 2, 128>}, {transform_indices = @transform_2, window_bounds = array<i64: 1, 1>}, {transform_indices = @transform_3, window_bounds = array<i64: 1, 1>}]} {
    %c1_i32 = arith.constant 1 : i32
    %0 = arith.muli %arg0, %c1_i32 : i32
    %1 = arith.addi %0, %arg1 : i32
    %c0_i32 = arith.constant 0 : i32
    %2 = arith.cmpi eq, %arg1, %c0_i32 : i32
    %3 = arith.extui %2 : i1 to i32
    %c0_i32_0 = arith.constant 0 : i32
    %4 = arith.cmpi ne, %3, %c0_i32_0 : i32
    scf.if %4 {
      %cst_10 = arith.constant 0.000000e+00 : f32
      %31 = vector.broadcast %cst_10 : f32 to vector<128x128xf32>
      %c0_11 = arith.constant 0 : index
      %c0_12 = arith.constant 0 : index
      %32 = vector.load %arg9[%c0_11, %c0_12] : memref<128x128xf32, #tpu.memory_space<vmem>>, vector<128x128xf32>
      tpu.vector_store %arg9[%c0_11, %c0_12], %31 {strides = array<i32>} : memref<128x128xf32, #tpu.memory_space<vmem>>, vector<128x128xf32>,
      %c0_i32_13 = arith.constant 0 : i32
      %33 = vector.broadcast %c0_i32_13 : i32 to vector<128x128xi32>
      %c0_14 = arith.constant 0 : index
      %c0_15 = arith.constant 0 : index
      %34 = vector.load %arg10[%c0_14, %c0_15] : memref<128x128xi32, #tpu.memory_space<vmem>>, vector<128x128xi32>
      tpu.vector_store %arg10[%c0_14, %c0_15], %33 {strides = array<i32>} : memref<128x128xi32, #tpu.memory_space<vmem>>, vector<128x128xi32>,
    } else {
    }
    %5 = arith.index_cast %1 : i32 to index
    %6 = memref.load %arg2[%5] : memref<1xi32, #tpu.memory_space<smem>>
    %7 = arith.index_cast %1 : i32 to index
    %8 = memref.load %arg3[%7] : memref<1xi32, #tpu.memory_space<smem>>
    %9 = arith.index_cast %1 : i32 to index
    %10 = memref.load %arg4[%9] : memref<1xi32, #tpu.memory_space<smem>>
    %c0_i32_1 = arith.constant 0 : i32
    %11 = arith.cmpi ne, %10, %c0_i32_1 : i32
    %c0 = arith.constant 0 : index
    %c0_2 = arith.constant 0 : index
    %12 = vector.load %arg5[%c0, %c0_2] : memref<128x2xf32, #tpu.memory_space<vmem>>, vector<128x2xf32>
    %c0_3 = arith.constant 0 : index
    %c0_4 = arith.constant 0 : index
    %13 = vector.load %arg6[%c0_3, %c0_4] : memref<2x128xf32, #tpu.memory_space<vmem>>, vector<2x128xf32>
    %cst = arith.constant 1.000000e+00 : f32
    %14 = vector.broadcast %cst : f32 to vector<2x128xf32>
    %15 = arith.addf %13, %14 : vector<2x128xf32>
    %16 = arith.cmpi eq, %6, %8 : i32
    %c1_i32_5 = arith.constant 1 : i32
    %17 = arith.addi %8, %c1_i32_5 : i32
    %c128_i32 = arith.constant 128 : i32
    %18 = arith.muli %17, %c128_i32 : i32
    %c8_i32 = arith.constant 8 : i32
    %19 = arith.cmpi sgt, %18, %c8_i32 : i32
    %20 = arith.ori %16, %19 : i1
    %true = arith.constant true
    %21 = arith.xori %20, %true : i1
    %22 = arith.andi %11, %21 : i1
    %23 = arith.extui %22 : i1 to i32
    %c0_i32_6 = arith.constant 0 : i32
    %24 = arith.cmpi ne, %23, %c0_i32_6 : i32
    scf.if %24 {
      %31 = vector.extract_strided_slice %15 {offsets = [0, 0], sizes = [1, 128], strides = [1, 1]} : vector<2x128xf32> to vector<1x128xf32>
      %32 = vector.extract_strided_slice %12 {offsets = [0, 0], sizes = [128, 1], strides = [1, 1]} : vector<128x2xf32> to vector<128x1xf32>
      %33 = vector.broadcast %31 : vector<1x128xf32> to vector<128x128xf32>
      %34 = vector.broadcast %32 : vector<128x1xf32> to vector<128x128xf32>
      %35 = arith.subf %33, %34 : vector<128x128xf32>
      %c0_10 = arith.constant 0 : index
      %c0_11 = arith.constant 0 : index
      %36 = vector.load %arg9[%c0_10, %c0_11] : memref<128x128xf32, #tpu.memory_space<vmem>>, vector<128x128xf32>
      %cst_12 = arith.constant 0.000000e+00 : f32
      %37 = vector.broadcast %cst_12 : f32 to vector<128x128xf32>
      %38 = arith.maximumf %35, %37 : vector<128x128xf32>
      %39 = arith.addf %36, %38 : vector<128x128xf32>
      %c0_13 = arith.constant 0 : index
      %c0_14 = arith.constant 0 : index
      %40 = vector.load %arg9[%c0_13, %c0_14] : memref<128x128xf32, #tpu.memory_space<vmem>>, vector<128x128xf32>
      tpu.vector_store %arg9[%c0_13, %c0_14], %39 {strides = array<i32>} : memref<128x128xf32, #tpu.memory_space<vmem>>, vector<128x128xf32>,
      %c0_15 = arith.constant 0 : index
      %c0_16 = arith.constant 0 : index
      %41 = vector.load %arg10[%c0_15, %c0_16] : memref<128x128xi32, #tpu.memory_space<vmem>>, vector<128x128xi32>
      %cst_17 = arith.constant 0.000000e+00 : f32
      %42 = vector.broadcast %cst_17 : f32 to vector<128x128xf32>
      %43 = arith.cmpf ogt, %35, %42 : vector<128x128xf32>
      %44 = arith.extui %43 : vector<128x128xi1> to vector<128x128xi32>
      %45 = arith.addi %41, %44 : vector<128x128xi32>
      %c0_18 = arith.constant 0 : index
      %c0_19 = arith.constant 0 : index
      %46 = vector.load %arg10[%c0_18, %c0_19] : memref<128x128xi32, #tpu.memory_space<vmem>>, vector<128x128xi32>
      tpu.vector_store %arg10[%c0_18, %c0_19], %45 {strides = array<i32>} : memref<128x128xi32, #tpu.memory_space<vmem>>, vector<128x128xi32>,
      %47 = vector.extract_strided_slice %15 {offsets = [1, 0], sizes = [1, 128], strides = [1, 1]} : vector<2x128xf32> to vector<1x128xf32>
      %48 = vector.extract_strided_slice %12 {offsets = [0, 1], sizes = [128, 1], strides = [1, 1]} : vector<128x2xf32> to vector<128x1xf32>
      %49 = vector.broadcast %47 : vector<1x128xf32> to vector<128x128xf32>
      %50 = vector.broadcast %48 : vector<128x1xf32> to vector<128x128xf32>
      %51 = arith.subf %49, %50 : vector<128x128xf32>
      %c0_20 = arith.constant 0 : index
      %c0_21 = arith.constant 0 : index
      %52 = vector.load %arg9[%c0_20, %c0_21] : memref<128x128xf32, #tpu.memory_space<vmem>>, vector<128x128xf32>
      %cst_22 = arith.constant 0.000000e+00 : f32
      %53 = vector.broadcast %cst_22 : f32 to vector<128x128xf32>
      %54 = arith.maximumf %51, %53 : vector<128x128xf32>
      %55 = arith.addf %52, %54 : vector<128x128xf32>
      %c0_23 = arith.constant 0 : index
      %c0_24 = arith.constant 0 : index
      %56 = vector.load %arg9[%c0_23, %c0_24] : memref<128x128xf32, #tpu.memory_space<vmem>>, vector<128x128xf32>
      tpu.vector_store %arg9[%c0_23, %c0_24], %55 {strides = array<i32>} : memref<128x128xf32, #tpu.memory_space<vmem>>, vector<128x128xf32>,
      %c0_25 = arith.constant 0 : index
      %c0_26 = arith.constant 0 : index
      %57 = vector.load %arg10[%c0_25, %c0_26] : memref<128x128xi32, #tpu.memory_space<vmem>>, vector<128x128xi32>
      %cst_27 = arith.constant 0.000000e+00 : f32
      %58 = vector.broadcast %cst_27 : f32 to vector<128x128xf32>
      %59 = arith.cmpf ogt, %51, %58 : vector<128x128xf32>
      %60 = arith.extui %59 : vector<128x128xi1> to vector<128x128xi32>
      %61 = arith.addi %57, %60 : vector<128x128xi32>
      %c0_28 = arith.constant 0 : index
      %c0_29 = arith.constant 0 : index
      %62 = vector.load %arg10[%c0_28, %c0_29] : memref<128x128xi32, #tpu.memory_space<vmem>>, vector<128x128xi32>
      tpu.vector_store %arg10[%c0_28, %c0_29], %61 {strides = array<i32>} : memref<128x128xi32, #tpu.memory_space<vmem>>, vector<128x128xi32>,
    } else {
    }
    %25 = arith.andi %11, %20 : i1
    %26 = arith.extui %25 : i1 to i32
    %c0_i32_7 = arith.constant 0 : i32
    %27 = arith.cmpi ne, %26, %c0_i32_7 : i32
    scf.if %27 {
      %31 = tpu.iota {dimensions = array<i32: 0>} : vector<128x128xi32>
      %c128_i32_10 = arith.constant 128 : i32
      %32 = arith.muli %6, %c128_i32_10 : i32
      %33 = vector.broadcast %32 : i32 to vector<128x128xi32>
      %34 = arith.addi %31, %33 : vector<128x128xi32>
      %35 = tpu.iota {dimensions = array<i32: 1>} : vector<128x128xi32>
      %c128_i32_11 = arith.constant 128 : i32
      %36 = arith.muli %8, %c128_i32_11 : i32
      %37 = vector.broadcast %36 : i32 to vector<128x128xi32>
      %38 = arith.addi %35, %37 : vector<128x128xi32>
      %39 = arith.cmpi sgt, %38, %34 : vector<128x128xi32>
      %c8_i32_12 = arith.constant 8 : i32
      %40 = vector.broadcast %c8_i32_12 : i32 to vector<128x128xi32>
      %41 = arith.cmpi slt, %38, %40 : vector<128x128xi32>
      %42 = arith.andi %39, %41 : vector<128x128xi1>
      %43 = vector.extract_strided_slice %15 {offsets = [0, 0], sizes = [1, 128], strides = [1, 1]} : vector<2x128xf32> to vector<1x128xf32>
      %44 = vector.extract_strided_slice %12 {offsets = [0, 0], sizes = [128, 1], strides = [1, 1]} : vector<128x2xf32> to vector<128x1xf32>
      %45 = vector.broadcast %43 : vector<1x128xf32> to vector<128x128xf32>
      %46 = vector.broadcast %44 : vector<128x1xf32> to vector<128x128xf32>
      %47 = arith.subf %45, %46 : vector<128x128xf32>
      %c0_13 = arith.constant 0 : index
      %c0_14 = arith.constant 0 : index
      %48 = vector.load %arg9[%c0_13, %c0_14] : memref<128x128xf32, #tpu.memory_space<vmem>>, vector<128x128xf32>
      %cst_15 = arith.constant 0.000000e+00 : f32
      %49 = vector.broadcast %cst_15 : f32 to vector<128x128xf32>
      %50 = arith.maximumf %47, %49 : vector<128x128xf32>
      %cst_16 = arith.constant 0.000000e+00 : f32
      %51 = vector.broadcast %cst_16 : f32 to vector<128x128xf32>
      %52 = arith.select %42, %50, %51 : vector<128x128xi1>, vector<128x128xf32>
      %53 = arith.addf %48, %52 : vector<128x128xf32>
      %c0_17 = arith.constant 0 : index
      %c0_18 = arith.constant 0 : index
      %54 = vector.load %arg9[%c0_17, %c0_18] : memref<128x128xf32, #tpu.memory_space<vmem>>, vector<128x128xf32>
      tpu.vector_store %arg9[%c0_17, %c0_18], %53 {strides = array<i32>} : memref<128x128xf32, #tpu.memory_space<vmem>>, vector<128x128xf32>,
      %c0_19 = arith.constant 0 : index
      %c0_20 = arith.constant 0 : index
      %55 = vector.load %arg10[%c0_19, %c0_20] : memref<128x128xi32, #tpu.memory_space<vmem>>, vector<128x128xi32>
      %cst_21 = arith.constant 0.000000e+00 : f32
      %56 = vector.broadcast %cst_21 : f32 to vector<128x128xf32>
      %57 = arith.cmpf ogt, %47, %56 : vector<128x128xf32>
      %58 = arith.andi %42, %57 : vector<128x128xi1>
      %59 = arith.extui %58 : vector<128x128xi1> to vector<128x128xi32>
      %60 = arith.addi %55, %59 : vector<128x128xi32>
      %c0_22 = arith.constant 0 : index
      %c0_23 = arith.constant 0 : index
      %61 = vector.load %arg10[%c0_22, %c0_23] : memref<128x128xi32, #tpu.memory_space<vmem>>, vector<128x128xi32>
      tpu.vector_store %arg10[%c0_22, %c0_23], %60 {strides = array<i32>} : memref<128x128xi32, #tpu.memory_space<vmem>>, vector<128x128xi32>,
      %62 = vector.extract_strided_slice %15 {offsets = [1, 0], sizes = [1, 128], strides = [1, 1]} : vector<2x128xf32> to vector<1x128xf32>
      %63 = vector.extract_strided_slice %12 {offsets = [0, 1], sizes = [128, 1], strides = [1, 1]} : vector<128x2xf32> to vector<128x1xf32>
      %64 = vector.broadcast %62 : vector<1x128xf32> to vector<128x128xf32>
      %65 = vector.broadcast %63 : vector<128x1xf32> to vector<128x128xf32>
      %66 = arith.subf %64, %65 : vector<128x128xf32>
      %c0_24 = arith.constant 0 : index
      %c0_25 = arith.constant 0 : index
      %67 = vector.load %arg9[%c0_24, %c0_25] : memref<128x128xf32, #tpu.memory_space<vmem>>, vector<128x128xf32>
      %cst_26 = arith.constant 0.000000e+00 : f32
      %68 = vector.broadcast %cst_26 : f32 to vector<128x128xf32>
      %69 = arith.maximumf %66, %68 : vector<128x128xf32>
      %cst_27 = arith.constant 0.000000e+00 : f32
      %70 = vector.broadcast %cst_27 : f32 to vector<128x128xf32>
      %71 = arith.select %42, %69, %70 : vector<128x128xi1>, vector<128x128xf32>
      %72 = arith.addf %67, %71 : vector<128x128xf32>
      %c0_28 = arith.constant 0 : index
      %c0_29 = arith.constant 0 : index
      %73 = vector.load %arg9[%c0_28, %c0_29] : memref<128x128xf32, #tpu.memory_space<vmem>>, vector<128x128xf32>
      tpu.vector_store %arg9[%c0_28, %c0_29], %72 {strides = array<i32>} : memref<128x128xf32, #tpu.memory_space<vmem>>, vector<128x128xf32>,
      %c0_30 = arith.constant 0 : index
      %c0_31 = arith.constant 0 : index
      %74 = vector.load %arg10[%c0_30, %c0_31] : memref<128x128xi32, #tpu.memory_space<vmem>>, vector<128x128xi32>
      %cst_32 = arith.constant 0.000000e+00 : f32
      %75 = vector.broadcast %cst_32 : f32 to vector<128x128xf32>
      %76 = arith.cmpf ogt, %66, %75 : vector<128x128xf32>
      %77 = arith.andi %42, %76 : vector<128x128xi1>
      %78 = arith.extui %77 : vector<128x128xi1> to vector<128x128xi32>
      %79 = arith.addi %74, %78 : vector<128x128xi32>
      %c0_33 = arith.constant 0 : index
      %c0_34 = arith.constant 0 : index
      %80 = vector.load %arg10[%c0_33, %c0_34] : memref<128x128xi32, #tpu.memory_space<vmem>>, vector<128x128xi32>
      tpu.vector_store %arg10[%c0_33, %c0_34], %79 {strides = array<i32>} : memref<128x128xi32, #tpu.memory_space<vmem>>, vector<128x128xi32>,
    } else {
    }
    %c0_i32_8 = arith.constant 0 : i32
    %28 = arith.cmpi eq, %arg1, %c0_i32_8 : i32
    %29 = arith.extui %28 : i1 to i32
    %c0_i32_9 = arith.constant 0 : i32
    %30 = arith.cmpi ne, %29, %c0_i32_9 : i32
    scf.if %30 {
      %c0_10 = arith.constant 0 : index
      %c0_11 = arith.constant 0 : index
      %31 = vector.load %arg9[%c0_10, %c0_11] : memref<128x128xf32, #tpu.memory_space<vmem>>, vector<128x128xf32>
      %32 = vector.shape_cast %31 : vector<128x128xf32> to vector<1x128x128xf32>
      %cst_12 = arith.constant dense<0.000000e+00> : vector<1xf32>
      %33 = vector.multi_reduction <add>, %32, %cst_12 [1, 2] : vector<1x128x128xf32> to vector<1xf32>
      %34 = vector.shape_cast %33 : vector<1xf32> to vector<1x1x1xf32>
      %35 = vector.extract %34[0, 0, 0] : f32 from vector<1x1x1xf32>
      %36 = vector.broadcast %35 : f32 to vector<1x1xf32>
      %c0_13 = arith.constant 0 : index
      %c0_14 = arith.constant 0 : index
      %37 = vector.load %arg7[%c0_13, %c0_14] : memref<1x1xf32, #tpu.memory_space<vmem>>, vector<1x1xf32>
      tpu.vector_store %arg7[%c0_13, %c0_14], %36 {strides = array<i32>} : memref<1x1xf32, #tpu.memory_space<vmem>>, vector<1x1xf32>,
      %c0_15 = arith.constant 0 : index
      %c0_16 = arith.constant 0 : index
      %38 = vector.load %arg10[%c0_15, %c0_16] : memref<128x128xi32, #tpu.memory_space<vmem>>, vector<128x128xi32>
      %39 = vector.shape_cast %38 : vector<128x128xi32> to vector<1x128x128xi32>
      %cst_17 = arith.constant dense<0> : vector<1xi32>
      %40 = vector.multi_reduction <add>, %39, %cst_17 [1, 2] : vector<1x128x128xi32> to vector<1xi32>
      %41 = vector.shape_cast %40 : vector<1xi32> to vector<1x1x1xi32>
      %42 = vector.extract %41[0, 0, 0] : i32 from vector<1x1x1xi32>
      %43 = vector.broadcast %42 : i32 to vector<1x1xi32>
      %c0_18 = arith.constant 0 : index
      %c0_19 = arith.constant 0 : index
      %44 = vector.load %arg8[%c0_18, %c0_19] : memref<1x1xi32, #tpu.memory_space<vmem>>, vector<1x1xi32>
      tpu.vector_store %arg8[%c0_18, %c0_19], %43 {strides = array<i32>} : memref<1x1xi32, #tpu.memory_space<vmem>>, vector<1x1xi32>,
    } else {
    }
    return
  }
  func.func @transform_0(%arg0: i32, %arg1: i32, %arg2: memref<1xi32, #tpu.memory_space<smem>>, %arg3: memref<1xi32, #tpu.memory_space<smem>>, %arg4: memref<1xi32, #tpu.memory_space<smem>>) -> (i32, i32) {
    %c1_i32 = arith.constant 1 : i32
    %0 = arith.muli %arg0, %c1_i32 : i32
    %1 = arith.addi %0, %arg1 : i32
    %2 = arith.index_cast %1 : i32 to index
    %3 = memref.load %arg2[%2] : memref<1xi32, #tpu.memory_space<smem>>
    %c0_i32 = arith.constant 0 : i32
    %c0_i32_0 = arith.constant 0 : i32
    return %3, %c0_i32 : i32, i32
  }
  func.func @transform_1(%arg0: i32, %arg1: i32, %arg2: memref<1xi32, #tpu.memory_space<smem>>, %arg3: memref<1xi32, #tpu.memory_space<smem>>, %arg4: memref<1xi32, #tpu.memory_space<smem>>) -> (i32, i32) {
    %c1_i32 = arith.constant 1 : i32
    %0 = arith.muli %arg0, %c1_i32 : i32
    %1 = arith.addi %0, %arg1 : i32
    %2 = arith.index_cast %1 : i32 to index
    %3 = memref.load %arg3[%2] : memref<1xi32, #tpu.memory_space<smem>>
    %c0_i32 = arith.constant 0 : i32
    %c0_i32_0 = arith.constant 0 : i32
    return %c0_i32, %3 : i32, i32
  }
  func.func @transform_2(%arg0: i32, %arg1: i32, %arg2: memref<1xi32, #tpu.memory_space<smem>>, %arg3: memref<1xi32, #tpu.memory_space<smem>>, %arg4: memref<1xi32, #tpu.memory_space<smem>>) -> (i32, i32) {
    %c0_i32 = arith.constant 0 : i32
    %c0_i32_0 = arith.constant 0 : i32
    return %arg0, %c0_i32 : i32, i32
  }
  func.func @transform_3(%arg0: i32, %arg1: i32, %arg2: memref<1xi32, #tpu.memory_space<smem>>, %arg3: memref<1xi32, #tpu.memory_space<smem>>, %arg4: memref<1xi32, #tpu.memory_space<smem>>) -> (i32, i32) {
    %c0_i32 = arith.constant 0 : i32
    %c0_i32_0 = arith.constant 0 : i32
    return %arg0, %c0_i32 : i32, i32
  }
}

</mosaic_0001>

<bundles_post_ra>
// kernel: tpu_custom_call.1
= control target key start
LH: loop header
LB: loop body
LE: loop exit
PB: predicated region body
PF: predicated region fallthrough
CT: control target
= control target key end

     0   :  { %15 = vsyncpa [#allocation9], 0  ;;  %s2483_s0 = inlined_call_operand.<no memory space> [shape: s32[1], index: 0, kind: input, shape index: {}]   ;;  %s2484_s1 = inlined_call_operand.<no memory space> [shape: s32[1], index: 1, kind: input, shape index: {}]   ;;  %s2485_s2 = inlined_call_operand.<no memory space> [shape: s32[1], index: 2, kind: input, shape index: {}]   ;;  %s2486_s3 = inlined_call_operand.vmem [shape: f32[128,2], index: 3, kind: input, shape index: {}]   ;;  %s2487_s4 = inlined_call_operand.vmem [shape: f32[2,128], index: 4, kind: input, shape index: {}]   ;;  %s2488_s5 = inlined_call_operand.hbm [shape: f32[1,1], index: 5, kind: output, shape index: {0}]   ;;  %s2489_s6 = inlined_call_operand.hbm [shape: s32[1,1], index: 6, kind: output, shape index: {1}]  }
   0x1   :  { %16 = vsyncpa [#allocation11], 0  ;;  %s1362_s23 = sshll.u32 %s2483_s0, 4  ;;  %p64_p0 = scmp.lt.s32.totalorder %s2484_s1, 0  ;;  %v1434_v0 = vmov 0.0   ;;  %v1435_v1 = vmov 0  }
   0x2   :  { %p1487_p1 = scmp.lt.s32.totalorder %s1362_s23, 15  ;;  %75 = vst [vmem:[#allocation2 + $0x30] sm:$0xff] %v1434_v0  ;;  %76 = vst [vmem:[#allocation2] sm:$0xff] %v1434_v0  ;;  %p129_p2 = scmp.eq.s32.totalorder %s2483_s0, %s2484_s1 }
   0x3   :  { %77 = vst [vmem:[#allocation2 + $0x58] sm:$0xff] %v1434_v0  ;;  %78 = vst [vmem:[#allocation2 + $0x18] sm:$0xff] %v1434_v0  ;;  %s65_s9 = scalar_select %p64_p0, %s2484_s1, 0 }
   0x4   :  { %79 = vst [vmem:[#allocation2 + $0x50] sm:$0xff] %v1434_v0  ;;  %80 = vst [vmem:[#allocation2 + $0x68] sm:$0xff] %v1434_v0  ;;  %s2599_s23 = smov (!%p1487_p1, %s1362_s23), 15  ;;  %s1368_s27 = sshll.u32 %s2484_s1, 7 }
   0x5   :  { %81 = vst [vmem:[#allocation2 + $0x8] sm:$0xff] %v1434_v0  ;;  %82 = vst [vmem:[#allocation2 + $0x48] sm:$0xff] %v1434_v0  ;;  %s1364_s12 = sshll.u32 %s65_s9, 1  ;;  %s1363_s17 = sshll.u32 %s2599_s23, 3 }
   0x6   :  { %83 = vst [vmem:[#allocation2 + $0x40] sm:$0xff] %v1434_v0  ;;  %84 = vst [vmem:[#allocation2 + $0x20] sm:$0xff] %v1434_v0  ;;  %s67_s20 = scalar_lea.vmem %s2487_s4, %s1364_s12  ;;  %s58_s24 = scalar_lea.vmem %s2486_s3, %s1363_s17 }
   0x7   :  { %85 = vst [vmem:[#allocation2 + $0x10] sm:$0xff] %v1434_v0  ;;  %86 = vst [vmem:[#allocation2 + $0x38] sm:$0xff] %v1434_v0  ;;  %v127_v2 = vld [vmem:[%s67_s20] sm:$0x3]  ;;  %v1521_v4 = vld [vmem:[%s58_s24 + $0x8] sm:$0xff]  ;;  %s1369_s4 = sadd.s32 128, %s1368_s27 }
   0x8   :  { %87 = vst [vmem:[#allocation2 + $0x60] sm:$0xff] %v1434_v0  ;;  %88 = vst [vmem:[#allocation2 + $0x70] sm:$0xff] %v1434_v0  ;;  %v1519_v3 = vld [vmem:[%s58_s24] sm:$0xff]  ;;  %v1523_v5 = vld [vmem:[%s58_s24 + $0x10] sm:$0xff]  ;;  %v1525_v6 = vadd.f32 1.0, %v127_v2  ;;  %p132_p3 = scmp.gt.s32.totalorder %s1369_s4, 8 }
   0x9   :  { %89 = vst [vmem:[#allocation2 + $0x78] sm:$0xff] %v1434_v0  ;;  %90 = vst [vmem:[#allocation2 + $0x28] sm:$0xff] %v1434_v0  ;;  %v1531_v7 = vld [vmem:[%s58_s24 + $0x18] sm:$0xff]  ;;  %v1533_v8 = vld [vmem:[%s58_s24 + $0x20] sm:$0xff]  ;;  %p110_p4 = scmp.ne.s32.totalorder %s2485_s2, 0 }
   0xa   :  { %91 = vst [vmem:[#allocation3 + $0x28] sm:$0xff] %v1435_v1  ;;  %92 = vst [vmem:[#allocation3 + $0x68] sm:$0xff] %v1435_v1  ;;  %v1535_v9 = vld [vmem:[%s58_s24 + $0x28] sm:$0xff]  ;;  %v1537_v10 = vld [vmem:[%s58_s24 + $0x30] sm:$0xff]  ;;  %p1559_p5 = por %p132_p3, %p129_p2 }
   0xb   :  { %93 = vst [vmem:[#allocation3 + $0x10] sm:$0xff] %v1435_v1  ;;  %94 = vst [vmem:[#allocation3 + $0x40] sm:$0xff] %v1435_v1  ;;  %v1539_v11 = vld [vmem:[%s58_s24 + $0x38] sm:$0xff]  ;;  %v1541_v12 = vld [vmem:[%s58_s24 + $0x40] sm:$0xff] }
   0xc   :  { %95 = vst [vmem:[#allocation3 + $0x48] sm:$0xff] %v1435_v1  ;;  %96 = vst [vmem:[#allocation3 + $0x30] sm:$0xff] %v1435_v1  ;;  %v1546_v13 = vld [vmem:[%s58_s24 + $0x48] sm:$0xff]  ;;  %v1548_v14 = vld [vmem:[%s58_s24 + $0x50] sm:$0xff]  ;;  %p134_p6 = pneg %p1559_p5 }
   0xd   :  { %97 = vst [vmem:[#allocation3 + $0x70] sm:$0xff] %v1435_v1  ;;  %98 = vst [vmem:[#allocation3 + $0x38] sm:$0xff] %v1435_v1  ;;  %v1550_v15 = vld [vmem:[%s58_s24 + $0x58] sm:$0xff]  ;;  %v1563_v16 = vld [vmem:[%s58_s24 + $0x60] sm:$0xff] }
   0xe   :  { %99 = vst [vmem:[#allocation3 + $0x20] sm:$0xff] %v1435_v1  ;;  %100 = vst [vmem:[#allocation3 + $0x78] sm:$0xff] %v1435_v1  ;;  %v1565_v17 = vld [vmem:[%s58_s24 + $0x68] sm:$0xff]  ;;  %v1567_v18 = vld [vmem:[%s58_s24 + $0x70] sm:$0xff]  ;;  %p135_p7 = pnand %p134_p6, %p110_p4 }
   0xf   :  { %101 = vst [vmem:[#allocation3 + $0x18] sm:$0xff] %v1435_v1  ;;  %102 = vst [vmem:[#allocation3 + $0x58] sm:$0xff] %v1435_v1  ;;  %v1569_v19 = vld [vmem:[%s58_s24 + $0x78] sm:$0xff] }
  0x10   :  { %103 = vst [vmem:[#allocation3] sm:$0xff] %v1435_v1  ;;  %104 = vst [vmem:[#allocation3 + $0x8] sm:$0xff] %v1435_v1  ;;  %138 = sbr.rel (%p135_p7) target bundleno = 216 (0xd8), region = 17 }
  0x11   :  { %105 = vst [vmem:[#allocation3 + $0x60] sm:$0xff] %v1435_v1  ;;  %106 = vst [vmem:[#allocation3 + $0x50] sm:$0xff] %v1435_v1 }
  0x12   :  { %2508 = vst [vmem:[#allocation14_spill] sm:$0xff] %v1525_v6  ;;  %2510 = vst [vmem:[#allocation15_spill] sm:$0xff] %v1567_v18 }
  0x15   :  { %v1436_v20 = vmov 0   ;;  %v1437_v21 = vmov 1   ;;  %v139_v22 = vlaneseq  ;;  %v241_v43 = vld [vmem:[#allocation2 + $0x58] sm:$0xff]  ;;  %v305_v44 = vld [vmem:[#allocation3 + $0x10] sm:$0xff]  ;;  %v303_v53 = vld [vmem:[#allocation3 + $0x28] sm:$0xff] }
  0x16   :  { %1383 = vset.pattern.permute.xlu1 %v1436_v20  ;;  %1382 = vset.pattern.permute.xlu0 %v1436_v20  ;;  %v239_v46 = vld [vmem:[#allocation2 + $0x30] sm:$0xff]  ;;  %v242_v54 = vld [vmem:[#allocation2 + $0x18] sm:$0xff]  ;;  %v306_v55 = vld [vmem:[#allocation3 + $0x40] sm:$0xff] }
  0x17   :  { %155 = vperm.xlu1 %1383, %v1523_v5   ;;  %145 = vperm.xlu0 %1382, %v1519_v3   ;;  %v140_v25 = vshrl.u32 %v139_v22, 7  ;;  %v240_v63 = vld [vmem:[#allocation2] sm:$0xff]  ;;  %v304_v1 = vld [vmem:[#allocation3 + $0x68] sm:$0xff] }
  0x19   :  { %v141_v28 = vsub.s32 0, %v140_v25  ;;  %v385_v40 = vsub.s32 1, %v140_v25 }
  0x1b   :  { %160 = vperm.xlu1 %1383, %v1531_v7   ;;  %150 = vperm.xlu0 %1382, %v1521_v4   ;;  %v1612_v31 = vrot.slane %v1525_v6, %v141_v28  ;;  %v1622_v52 = vrot.slane %v1525_v6, %v385_v40 }
  0x1f   :  { %170 = vperm.xlu1 %1383, %v1535_v9   ;;  %165 = vperm.xlu0 %1382, %v1533_v8  }
  0x23   :  { %180 = vperm.xlu1 %1383, %v1539_v11   ;;  %175 = vperm.xlu0 %1382, %v1537_v10  }
  0x27   :  { %190 = vperm.xlu1 %1383, %v1546_v13   ;;  %185 = vperm.xlu0 %1382, %v1541_v12  }
  0x2b   :  { %200 = vperm.xlu1 %1383, %v1550_v15   ;;  %195 = vperm.xlu0 %1382, %v1548_v14  }
  0x2f   :  { %210 = vperm.xlu1 %1383, %v1565_v17   ;;  %205 = vperm.xlu0 %1382, %v1563_v16  }
  0x33   :  { %220 = vperm.xlu1 %1383, %v1569_v19   ;;  %215 = vperm.xlu0 %1382, %v1567_v18  }
  0x37   :  { %1385 = vset.pattern.permute.xlu1 %v1437_v21  ;;  %1384 = vset.pattern.permute.xlu0 %v1437_v21 }
  0x38   :  { %392 = vperm.xlu1 %1385, %v1521_v4   ;;  %388 = vperm.xlu0 %1384, %v1519_v3  }
  0x3c   :  { %396 = vperm.xlu1 %1385, %v1523_v5   ;;  %400 = vperm.xlu0 %1384, %v1531_v7  }
  0x40   :  { %404 = vperm.xlu1 %1385, %v1533_v8   ;;  %408 = vperm.xlu0 %1384, %v1535_v9  }
  0x44   :  { %412 = vperm.xlu1 %1385, %v1537_v10   ;;  %416 = vperm.xlu0 %1384, %v1539_v11  }
  0x48   :  { %420 = vperm.xlu1 %1385, %v1541_v12   ;;  %424 = vperm.xlu0 %1384, %v1546_v13  }
  0x4c   :  { %428 = vperm.xlu1 %1385, %v1548_v14   ;;  %432 = vperm.xlu0 %1384, %v1550_v15  }
  0x50   :  { %436 = vperm.xlu1 %1385, %v1563_v16   ;;  %440 = vperm.xlu0 %1384, %v1565_v17  }
  0x54   :  { %444 = vperm.xlu1 %1385, %v1567_v18   ;;  %448 = vperm.xlu0 %1384, %v1569_v19  }
  0x92   :  { %v156_v23 = vpop.permute.xlu1 %155  ;;  %v146_v24 = vpop.permute.xlu0 %145 }
  0x93   :  { %v225_v34 = vsub.f32 %v1612_v31, %v156_v23  ;;  %v223_v35 = vsub.f32 %v1612_v31, %v146_v24 }
  0x95   :  { %vm321_vm0 = vcmp.gt.f32.partialorder %v225_v34, 0.0  ;;  %vm319_vm1 = vcmp.gt.f32.partialorder %v223_v35, 0.0  ;;  %v257_v41 = vmax.f32 %v225_v34, 0.0  ;;  %v255_v42 = vmax.f32 %v223_v35, 0.0 }
  0x96   :  { %v161_v26 = vpop.permute.xlu1 %160  ;;  %v151_v27 = vpop.permute.xlu0 %150  ;;  %v337_v45 = vsel %vm321_vm0, 1, %v1436_v20  ;;  %v335_v50 = vsel %vm319_vm1, 1, %v1436_v20 }
  0x97   :  { %v226_v36 = vsub.f32 %v1612_v31, %v161_v26  ;;  %v224_v39 = vsub.f32 %v1612_v31, %v151_v27  ;;  %v1627_v60 = vadd.f32 %v257_v41, %v241_v43  ;;  %v1629_v61 = vadd.s32 %v337_v45, %v305_v44  ;;  %v246_v45 = vld [vmem:[#allocation2 + $0x48] sm:$0xff] }
  0x98   :  { %v1631_v62 = vadd.f32 %v255_v42, %v239_v46  ;;  %v1641_v25 = vadd.s32 %v335_v50, %v303_v53  ;;  %v310_v46 = vld [vmem:[#allocation3 + $0x38] sm:$0xff]  ;;  %v248_v53 = vld [vmem:[#allocation2 + $0x20] sm:$0xff] }
  0x99   :  { %vm322_vm2 = vcmp.gt.f32.partialorder %v226_v36, 0.0  ;;  %v258_v51 = vmax.f32 %v226_v36, 0.0  ;;  %vm320_vm3 = vcmp.gt.f32.partialorder %v224_v39, 0.0  ;;  %v256_v57 = vmax.f32 %v224_v39, 0.0  ;;  %v308_v36 = vld [vmem:[#allocation3 + $0x30] sm:$0xff] }
  0x9a   :  { %v171_v29 = vpop.permute.xlu1 %170  ;;  %v166_v30 = vpop.permute.xlu0 %165  ;;  %v338_v56 = vsel %vm322_vm2, 1, %v1436_v20  ;;  %v336_v2 = vsel %vm320_vm3, 1, %v1436_v20 }
  0x9b   :  { %v228_v47 = vsub.f32 %v1612_v31, %v171_v29  ;;  %v227_v58 = vsub.f32 %v1612_v31, %v166_v30  ;;  %v1643_v26 = vadd.f32 %v258_v51, %v242_v54  ;;  %v1645_v27 = vadd.s32 %v338_v56, %v306_v55  ;;  %v244_v30 = vld [vmem:[#allocation2 + $0x68] sm:$0xff]  ;;  %v309_v51 = vld [vmem:[#allocation3 + $0x70] sm:$0xff] }
  0x9c   :  { %v1647_v29 = vadd.f32 %v256_v57, %v240_v63 }
  0x9d   :  { %vm324_vm4 = vcmp.gt.f32.partialorder %v228_v47, 0.0  ;;  %v260_v28 = vmax.f32 %v228_v47, 0.0  ;;  %vm323_vm5 = vcmp.gt.f32.partialorder %v227_v58, 0.0  ;;  %v259_v35 = vmax.f32 %v227_v58, 0.0  ;;  %v312_v58 = vld [vmem:[#allocation3 + $0x78] sm:$0xff] }
  0x9e   :  { %v181_v32 = vpop.permute.xlu1 %180  ;;  %v176_v33 = vpop.permute.xlu0 %175  ;;  %v340_v34 = vsel %vm324_vm4, 1, %v1436_v20  ;;  %v339_v44 = vsel %vm323_vm5, 1, %v1436_v20 }
  0x9f   :  { %v230_v59 = vsub.f32 %v1612_v31, %v181_v32  ;;  %v229_v0 = vsub.f32 %v1612_v31, %v176_v33  ;;  %v1650_v33 = vadd.s32 %v336_v2, %v304_v1  ;;  %v1660_v43 = vadd.f32 %v260_v28, %v244_v30  ;;  %v311_v1 = vld [vmem:[#allocation3 + $0x20] sm:$0xff] }
  0xa0   :  { %v1668_v56 = vadd.s32 %v340_v34, %v308_v36 }
  0xa1   :  { %vm326_vm6 = vcmp.gt.f32.partialorder %v230_v59, 0.0  ;;  %vm325_vm7 = vcmp.gt.f32.partialorder %v229_v0, 0.0  ;;  %v262_v39 = vmax.f32 %v230_v59, 0.0  ;;  %v261_v50 = vmax.f32 %v229_v0, 0.0  ;;  %v247_v59 = vld [vmem:[#allocation2 + $0x40] sm:$0xff] }
  0xa2   :  { %v191_v37 = vpop.permute.xlu1 %190  ;;  %v186_v38 = vpop.permute.xlu0 %185  ;;  %v342_v47 = vsel %vm326_vm6, 1, %v1436_v20 }
  0xa3   :  { %v232_v21 = vsub.f32 %v1612_v31, %v191_v37  ;;  %v231_v22 = vsub.f32 %v1612_v31, %v186_v38  ;;  %v243_v37 = vld [vmem:[#allocation2 + $0x50] sm:$0xff]  ;;  %v307_v38 = vld [vmem:[#allocation3 + $0x48] sm:$0xff]  ;;  %v1678_v0 = vadd.f32 %v262_v39, %v246_v45  ;;  %v1681_v34 = vadd.s32 %v342_v47, %v310_v46 }
  0xa4   :  { %v1670_v57 = vadd.f32 %v259_v35, %v243_v37  ;;  %v1676_v28 = vadd.s32 %v339_v44, %v307_v38  ;;  %v314_v37 = vld [vmem:[#allocation3 + $0x58] sm:$0xff] }
  0xa5   :  { %vm328_vm8 = vcmp.gt.f32.partialorder %v232_v21, 0.0  ;;  %vm327_vm9 = vcmp.gt.f32.partialorder %v231_v22, 0.0  ;;  %v264_v54 = vmax.f32 %v232_v21, 0.0  ;;  %v263_v55 = vmax.f32 %v231_v22, 0.0  ;;  %v250_v21 = vld [vmem:[#allocation2 + $0x38] sm:$0xff] }
  0xa6   :  { %v201_v48 = vpop.permute.xlu1 %200  ;;  %v196_v49 = vpop.permute.xlu0 %195  ;;  %v344_v63 = vsel %vm328_vm8, 1, %v1436_v20  ;;  %v343_v2 = vsel %vm327_vm9, 1, %v1436_v20 }
  0xa7   :  { %v234_v32 = vsub.f32 %v1612_v31, %v201_v48  ;;  %v1654_v40 = vsub.f32 %v1612_v31, %v196_v49  ;;  %v245_v48 = vld [vmem:[#allocation2 + $0x8] sm:$0xff]  ;;  %v341_v49 = vsel %vm325_vm7, 1, %v1436_v20  ;;  %v1689_v38 = vadd.f32 %v264_v54, %v248_v53 }
  0xa8   :  { %v1683_v35 = vadd.f32 %v261_v50, %v245_v48  ;;  %v1685_v36 = vadd.s32 %v341_v49, %v309_v51  ;;  %v1691_v39 = vadd.s32 %v344_v63, %v312_v58  ;;  %v1693_v44 = vadd.f32 %v263_v55, %v247_v59  ;;  %v249_v63 = vld [vmem:[#allocation2 + $0x10] sm:$0xff] }
  0xa9   :  { %vm330_vm10 = vcmp.gt.f32.partialorder %v234_v32, 0.0  ;;  %v266_v30 = vmax.f32 %v234_v32, 0.0  ;;  %vm329_vm11 = vcmp.gt.f32.partialorder %v1654_v40, 0.0  ;;  %v1695_v45 = vadd.s32 %v343_v2, %v311_v1 }
  0xaa   :  { %v1637_v23 = vpop.permute.xlu1 %210  ;;  %v1639_v24 = vpop.permute.xlu0 %205  ;;  %v346_v6 = vsel %vm330_vm10, 1, %v1436_v20  ;;  %v265_v46 = vmax.f32 %v1654_v40, 0.0  ;;  %v345_v47 = vsel %vm329_vm11, 1, %v1436_v20 }
  0xab   :  { %v1701_v32 = vadd.f32 %v266_v30, %v250_v21  ;;  %v1703_v51 = vadd.s32 %v346_v6, %v314_v37  ;;  %v1707_v49 = vsub.f32 %v1612_v31, %v1637_v23  ;;  %v1711_v53 = vsub.f32 %v1612_v31, %v1639_v24  ;;  %v313_v21 = vld [vmem:[#allocation3 + $0x18] sm:$0xff] }
  0xad   :  { %vm332_vm0 = vcmp.gt.f32.partialorder %v1707_v49, 0.0  ;;  %vm331_vm1 = vcmp.gt.f32.partialorder %v1711_v53, 0.0 }
  0xae   :  { %v1656_v41 = vpop.permute.xlu1 %220  ;;  %v1658_v42 = vpop.permute.xlu0 %215 }
  0xb3   :  { %v393_v22 = vpop.permute.xlu1 %392  ;;  %v389_v18 = vpop.permute.xlu0 %388 }
  0xb4   :  { %v452_v48 = vsub.f32 %v1622_v52, %v393_v22  ;;  %v451_v50 = vsub.f32 %v1622_v52, %v389_v18 }
  0xb6   :  { %v484_v54 = vmax.f32 %v452_v48, 0.0  ;;  %vm548_vm12 = vcmp.gt.f32.partialorder %v452_v48, 0.0  ;;  %v483_v40 = vmax.f32 %v451_v50, 0.0  ;;  %vm547_vm13 = vcmp.gt.f32.partialorder %v451_v50, 0.0 }
  0xb7   :  { %v397_v55 = vpop.permute.xlu1 %396  ;;  %v401_v58 = vpop.permute.xlu0 %400  ;;  %v564_v18 = vsel %vm548_vm12, 1, %v1436_v20  ;;  %v563_v6 = vsel %vm547_vm13, 1, %v1436_v20  ;;  %v1721_v48 = vadd.f32 %v265_v46, %v249_v63 }
  0xb8   :  { %v453_v59 = vsub.f32 %v1622_v52, %v397_v55  ;;  %v454_v23 = vsub.f32 %v1622_v52, %v401_v58  ;;  %v500_v1 = vadd.f32 %v484_v54, %v1647_v29  ;;  %v580_v24 = vadd.s32 %v564_v18, %v1650_v33 }
  0xb9   :  { %v499_v2 = vadd.f32 %v483_v40, %v1631_v62  ;;  %v579_v30 = vadd.s32 %v563_v6, %v1641_v25  ;;  %v1730_v55 = vadd.s32 %v345_v47, %v313_v21  ;;  %v268_v58 = vmax.f32 %v1707_v49, 0.0  ;;  %v316_v21 = vld [vmem:[#allocation3 + $0x8] sm:$0xff] }
  0xba   :  { %v485_v37 = vmax.f32 %v453_v59, 0.0  ;;  %vm549_vm14 = vcmp.gt.f32.partialorder %v453_v59, 0.0  ;;  %v486_v22 = vmax.f32 %v454_v23, 0.0  ;;  %vm550_vm15 = vcmp.gt.f32.partialorder %v454_v23, 0.0  ;;  %516 = vst [vmem:[#allocation2] sm:$0xff] %v500_v1  ;;  %596 = vst [vmem:[#allocation3 + $0x68] sm:$0xff] %v580_v24 }
  0xbb   :  { %515 = vst [vmem:[#allocation2 + $0x30] sm:$0xff] %v499_v2  ;;  %595 = vst [vmem:[#allocation3 + $0x28] sm:$0xff] %v579_v30  ;;  %v565_v29 = vsel %vm549_vm14, 1, %v1436_v20  ;;  %v566_v33 = vsel %vm550_vm15, 1, %v1436_v20  ;;  %v405_v62 = vpop.permute.xlu1 %404  ;;  %v409_v50 = vpop.permute.xlu0 %408  ;;  %v348_v6 = vsel %vm332_vm0, 1, %v1436_v20  ;;  %v252_v30 = vld [vmem:[#allocation2 + $0x70] sm:$0xff] }
  0xbc   :  { %v501_v25 = vadd.f32 %v485_v37, %v1627_v60  ;;  %v581_v54 = vadd.s32 %v565_v29, %v1629_v61  ;;  %v502_v40 = vadd.f32 %v486_v22, %v1643_v26  ;;  %v582_v46 = vadd.s32 %v566_v33, %v1645_v27 }
  0xbd   :  { %v455_v63 = vsub.f32 %v1622_v52, %v405_v62  ;;  %v456_v18 = vsub.f32 %v1622_v52, %v409_v50  ;;  %v1741_v60 = vsub.f32 %v1612_v31, %v1656_v41  ;;  %v1745_v61 = vsub.f32 %v1612_v31, %v1658_v42 }
  0xbe   :  { %517 = vst [vmem:[#allocation2 + $0x58] sm:$0xff] %v501_v25  ;;  %597 = vst [vmem:[#allocation3 + $0x10] sm:$0xff] %v581_v54  ;;  %v267_v29 = vmax.f32 %v1711_v53, 0.0  ;;  %v1759_v33 = vsel %vm331_vm1, 1, %v1436_v20 }
  0xbf   :  { %518 = vst [vmem:[#allocation2 + $0x18] sm:$0xff] %v502_v40  ;;  %598 = vst [vmem:[#allocation3 + $0x40] sm:$0xff] %v582_v46  ;;  %v487_v26 = vmax.f32 %v455_v63, 0.0  ;;  %vm551_vm2 = vcmp.gt.f32.partialorder %v455_v63, 0.0  ;;  %v488_v27 = vmax.f32 %v456_v18, 0.0  ;;  %vm552_vm3 = vcmp.gt.f32.partialorder %v456_v18, 0.0  ;;  %v413_v47 = vpop.permute.xlu1 %412  ;;  %v417_v49 = vpop.permute.xlu0 %416 }
  0xc0   :  { %v567_v59 = vsel %vm551_vm2, 1, %v1436_v20  ;;  %v568_v23 = vsel %vm552_vm3, 1, %v1436_v20  ;;  %v457_v41 = vsub.f32 %v1622_v52, %v413_v47  ;;  %v458_v1 = vsub.f32 %v1622_v52, %v417_v49 }
  0xc1   :  { %v503_v31 = vadd.f32 %v487_v26, %v1670_v57  ;;  %v583_v42 = vadd.s32 %v567_v59, %v1676_v28  ;;  %v504_v24 = vadd.f32 %v488_v27, %v1660_v43  ;;  %v584_v2 = vadd.s32 %v568_v23, %v1668_v56  ;;  %v251_v59 = vld [vmem:[#allocation2 + $0x60] sm:$0xff] }
  0xc2   :  { %v489_v37 = vmax.f32 %v457_v41, 0.0  ;;  %vm553_vm4 = vcmp.gt.f32.partialorder %v457_v41, 0.0  ;;  %v490_v22 = vmax.f32 %v458_v1, 0.0  ;;  %vm554_vm5 = vcmp.gt.f32.partialorder %v458_v1, 0.0  ;;  %v315_v23 = vld [vmem:[#allocation3] sm:$0xff] }
  0xc3   :  { %519 = vst [vmem:[#allocation2 + $0x50] sm:$0xff] %v503_v31  ;;  %599 = vst [vmem:[#allocation3 + $0x48] sm:$0xff] %v583_v42  ;;  %v569_v43 = vsel %vm553_vm4, 1, %v1436_v20  ;;  %v570_v56 = vsel %vm554_vm5, 1, %v1436_v20  ;;  %v421_v57 = vpop.permute.xlu1 %420  ;;  %v425_v28 = vpop.permute.xlu0 %424  ;;  %v1767_v40 = vadd.f32 %v268_v58, %v252_v30  ;;  %v1769_v46 = vadd.s32 %v348_v6, %v316_v21 }
  0xc4   :  { %520 = vst [vmem:[#allocation2 + $0x68] sm:$0xff] %v504_v24  ;;  %600 = vst [vmem:[#allocation3 + $0x30] sm:$0xff] %v584_v2  ;;  %v505_v62 = vadd.f32 %v489_v37, %v1683_v35  ;;  %v585_v50 = vadd.s32 %v569_v43, %v1685_v36  ;;  %v506_v25 = vadd.f32 %v490_v22, %v1678_v0  ;;  %v270_v26 = vmax.f32 %v1741_v60, 0.0  ;;  %v254_v24 = vld [vmem:[#allocation2 + $0x28] sm:$0xff]  ;;  %v318_v2 = vld [vmem:[#allocation3 + $0x50] sm:$0xff] }
  0xc5   :  { %v586_v54 = vadd.s32 %v570_v56, %v1681_v34  ;;  %v459_v63 = vsub.f32 %v1622_v52, %v421_v57  ;;  %v460_v18 = vsub.f32 %v1622_v52, %v425_v28  ;;  %vm334_vm6 = vcmp.gt.f32.partialorder %v1741_v60, 0.0  ;;  %v253_v22 = vld [vmem:[#allocation2 + $0x78] sm:$0xff]  ;;  %v317_v43 = vld [vmem:[#allocation3 + $0x60] sm:$0xff] }
  0xc6   :  { %v269_v35 = vmax.f32 %v1745_v61, 0.0  ;;  %vm333_vm7 = vcmp.gt.f32.partialorder %v1745_v61, 0.0  ;;  %521 = vst [vmem:[#allocation2 + $0x8] sm:$0xff] %v505_v62  ;;  %601 = vst [vmem:[#allocation3 + $0x70] sm:$0xff] %v585_v50  ;;  %v350_v37 = vsel %vm334_vm6, 1, %v1436_v20  ;;  %v283_v61 = vadd.f32 %v267_v29, %v251_v59 }
  0xc7   :  { %522 = vst [vmem:[#allocation2 + $0x48] sm:$0xff] %v506_v25  ;;  %602 = vst [vmem:[#allocation3 + $0x38] sm:$0xff] %v586_v54  ;;  %v491_v0 = vmax.f32 %v459_v63, 0.0  ;;  %vm555_vm8 = vcmp.gt.f32.partialorder %v459_v63, 0.0  ;;  %v492_v34 = vmax.f32 %v460_v18, 0.0  ;;  %vm556_vm9 = vcmp.gt.f32.partialorder %v460_v18, 0.0  ;;  %v429_v36 = vpop.permute.xlu1 %428  ;;  %v433_v58 = vpop.permute.xlu0 %432 }
  0xc8   :  { %v571_v6 = vsel %vm555_vm8, 1, %v1436_v20  ;;  %v572_v27 = vsel %vm556_vm9, 1, %v1436_v20  ;;  %v461_v47 = vsub.f32 %v1622_v52, %v429_v36  ;;  %v462_v49 = vsub.f32 %v1622_v52, %v433_v58 }
  0xc9   :  { %v507_v41 = vadd.f32 %v491_v0, %v1693_v44  ;;  %v587_v1 = vadd.s32 %v571_v6, %v1695_v45  ;;  %v508_v31 = vadd.f32 %v492_v34, %v1689_v38  ;;  %v588_v42 = vadd.s32 %v572_v27, %v1691_v39 }
  0xca   :  { %v493_v30 = vmax.f32 %v461_v47, 0.0  ;;  %vm557_vm10 = vcmp.gt.f32.partialorder %v461_v47, 0.0  ;;  %v494_v21 = vmax.f32 %v462_v49, 0.0  ;;  %vm558_vm11 = vcmp.gt.f32.partialorder %v462_v49, 0.0 }
  0xcb   :  { %v349_v44 = vsel %vm333_vm7, 1, %v1436_v20  ;;  %523 = vst [vmem:[#allocation2 + $0x40] sm:$0xff] %v507_v41  ;;  %603 = vst [vmem:[#allocation3 + $0x20] sm:$0xff] %v587_v1  ;;  %v573_v38 = vsel %vm557_vm10, 1, %v1436_v20  ;;  %v574_v39 = vsel %vm558_vm11, 1, %v1436_v20  ;;  %v437_v45 = vpop.permute.xlu1 %436  ;;  %v441_v56 = vpop.permute.xlu0 %440  ;;  %v363_v50 = vadd.s32 %v1759_v33, %v315_v23 }
  0xcc   :  { %524 = vst [vmem:[#allocation2 + $0x20] sm:$0xff] %v508_v31  ;;  %604 = vst [vmem:[#allocation3 + $0x78] sm:$0xff] %v588_v42  ;;  %v509_v57 = vadd.f32 %v493_v30, %v1721_v48  ;;  %v589_v60 = vadd.s32 %v573_v38, %v1730_v55  ;;  %v510_v28 = vadd.f32 %v494_v21, %v1701_v32 }
  0xcd   :  { %v590_v62 = vadd.s32 %v574_v39, %v1703_v51  ;;  %v463_v25 = vsub.f32 %v1622_v52, %v437_v45  ;;  %v464_v54 = vsub.f32 %v1622_v52, %v441_v56  ;;  %v286_v63 = vadd.f32 %v270_v26, %v254_v24 }
  0xce   :  { %v366_v18 = vadd.s32 %v350_v37, %v318_v2  ;;  %v285_v0 = vadd.f32 %v269_v35, %v253_v22  ;;  %v365_v34 = vadd.s32 %v349_v44, %v317_v43  ;;  %525 = vst [vmem:[#allocation2 + $0x10] sm:$0xff] %v509_v57  ;;  %605 = vst [vmem:[#allocation3 + $0x18] sm:$0xff] %v589_v60 }
  0xcf   :  { %526 = vst [vmem:[#allocation2 + $0x38] sm:$0xff] %v510_v28  ;;  %606 = vst [vmem:[#allocation3 + $0x58] sm:$0xff] %v590_v62  ;;  %v495_v32 = vmax.f32 %v463_v25, 0.0  ;;  %vm559_vm12 = vcmp.gt.f32.partialorder %v463_v25, 0.0  ;;  %v496_v51 = vmax.f32 %v464_v54, 0.0  ;;  %vm560_vm13 = vcmp.gt.f32.partialorder %v464_v54, 0.0  ;;  %v445_v53 = vpop.permute.xlu1 %444  ;;  %v449_v48 = vpop.permute.xlu0 %448 }
  0xd0   :  { %v575_v55 = vsel %vm559_vm12, 1, %v1436_v20  ;;  %v576_v29 = vsel %vm560_vm13, 1, %v1436_v20  ;;  %v465_v33 = vsub.f32 %v1622_v52, %v445_v53  ;;  %v466_v26 = vsub.f32 %v1622_v52, %v449_v48 }
  0xd1   :  { %v511_v35 = vadd.f32 %v495_v32, %v283_v61  ;;  %v591_v36 = vadd.s32 %v575_v55, %v363_v50  ;;  %v512_v58 = vadd.f32 %v496_v51, %v1767_v40  ;;  %v592_v6 = vadd.s32 %v576_v29, %v1769_v46 }
  0xd2   :  { %v497_v27 = vmax.f32 %v465_v33, 0.0  ;;  %vm561_vm14 = vcmp.gt.f32.partialorder %v465_v33, 0.0  ;;  %v498_v47 = vmax.f32 %v466_v26, 0.0  ;;  %vm562_vm15 = vcmp.gt.f32.partialorder %v466_v26, 0.0 }
  0xd3   :  { %527 = vst [vmem:[#allocation2 + $0x60] sm:$0xff] %v511_v35  ;;  %607 = vst [vmem:[#allocation3] sm:$0xff] %v591_v36  ;;  %v577_v49 = vsel %vm561_vm14, 1, %v1436_v20  ;;  %v578_v59 = vsel %vm562_vm15, 1, %v1436_v20 }
  0xd4   :  { %528 = vst [vmem:[#allocation2 + $0x70] sm:$0xff] %v512_v58  ;;  %608 = vst [vmem:[#allocation3 + $0x8] sm:$0xff] %v592_v6  ;;  %v513_v23 = vadd.f32 %v497_v27, %v285_v0  ;;  %v593_v52 = vadd.s32 %v577_v49, %v365_v34  ;;  %v514_v41 = vadd.f32 %v498_v47, %v286_v63 }
  0xd5   :  { %v594_v1 = vadd.s32 %v578_v59, %v366_v18 }
  0xd6   :  { %529 = vst [vmem:[#allocation2 + $0x78] sm:$0xff] %v513_v23  ;;  %609 = vst [vmem:[#allocation3 + $0x60] sm:$0xff] %v593_v52 }
  0xd7   :  { %530 = vst [vmem:[#allocation2 + $0x28] sm:$0xff] %v514_v41  ;;  %610 = vst [vmem:[#allocation3 + $0x50] sm:$0xff] %v594_v1 }
  0xd8 PF:  { %p611_p8 = pnand %p1559_p5, %p110_p4 }
  0xd9   :  { %s1366_s16 = sshll.u32 (!%p611_p8), %s2483_s0, 7 }
  0xda   :  { %614 = sbr.rel (%p611_p8) target bundleno = 421 (0x1a5), region = 21 }
  0xdf   :  { %v2503_v40 = vmov 0   ;;  %v2511_v20 = vld [vmem:[#allocation15_spill] sm:$0xff]  ;;  %v1439_v46 = vmov 1   ;;  %v2513_v62 = vmov 0  ;;  %v2515_v25 = vmov 0 }
  0xe0   :  { %1387 = vset.pattern.permute.xlu1 %v2503_v40  ;;  %1386 = vset.pattern.permute.xlu0 %v2503_v40  ;;  %v2517_v18 = vmov 0  ;;  %v2521_v35 = vmov 0 }
  0xe1   :  { %704 = vperm.xlu1 %1387, %v1523_v5   ;;  %694 = vperm.xlu0 %1386, %v1519_v3  }
  0xe5   :  { %709 = vperm.xlu1 %1387, %v1531_v7   ;;  %699 = vperm.xlu0 %1386, %v1521_v4  }
  0xe9   :  { %719 = vperm.xlu1 %1387, %v1535_v9   ;;  %714 = vperm.xlu0 %1386, %v1533_v8  }
  0xed   :  { %729 = vperm.xlu1 %1387, %v1539_v11   ;;  %724 = vperm.xlu0 %1386, %v1537_v10  }
  0xf1   :  { %739 = vperm.xlu1 %1387, %v1546_v13   ;;  %734 = vperm.xlu0 %1386, %v1541_v12  }
  0xf5   :  { %749 = vperm.xlu1 %1387, %v1550_v15   ;;  %744 = vperm.xlu0 %1386, %v1548_v14  }
  0xf9   :  { %759 = vperm.xlu1 %1387, %v1565_v17   ;;  %754 = vperm.xlu0 %1386, %v1563_v16  }
  0xfd   :  { %769 = vperm.xlu1 %1387, %v1569_v19   ;;  %764 = vperm.xlu0 %1386, %v2511_v20  }
 0x101   :  { %1389 = vset.pattern.permute.xlu1 %v1439_v46  ;;  %1388 = vset.pattern.permute.xlu0 %v1439_v46 }
 0x102   :  { %973 = vperm.xlu1 %1389, %v1521_v4   ;;  %969 = vperm.xlu0 %1388, %v1519_v3   ;;  %v615_v3 = vlaneseq }
 0x104   :  { %v1850_v4 = vshrl.u32 %v615_v3, 7 }
 0x106   :  { %977 = vperm.xlu1 %1389, %v1523_v5   ;;  %981 = vperm.xlu0 %1388, %v1531_v7   ;;  %v651_v5 = vand.u32 127, %v615_v3  ;;  %v618_v7 = vadd.s32 16, %v1850_v4  ;;  %v620_v24 = vadd.s32 32, %v1850_v4  ;;  %v623_v30 = vadd.s32 56, %v1850_v4  ;;  %v790_v3 = vld [vmem:[#allocation2 + $0x58] sm:$0xff] }
 0x107   :  { %v622_v37 = vadd.s32 48, %v1850_v4  ;;  %v625_v43 = vadd.s32 72, %v1850_v4  ;;  %v624_v56 = vadd.s32 64, %v1850_v4  ;;  %v627_v60 = vadd.s32 88, %v1850_v4 }
 0x108   :  { %v626_v28 = vadd.s32 80, %v1850_v4  ;;  %v629_v63 = vadd.s32 104, %v1850_v4  ;;  %v628_v29 = vadd.s32 96, %v1850_v4  ;;  %v631_v6 = vadd.s32 120, %v1850_v4 }
 0x109   :  { %v630_v27 = vadd.s32 112, %v1850_v4  ;;  %v966_v52 = vsub.s32 1, %v1850_v4 }
 0x10a   :  { %985 = vperm.xlu1 %1389, %v1533_v8   ;;  %989 = vperm.xlu0 %1388, %v1535_v9   ;;  %v1856_v8 = vstv %s1366_s16  ;;  %v653_v9 = vstv %s1368_s27 }
 0x10b   :  { %v638_v45 = vadd.s32 %v1856_v8, %v620_v24  ;;  %v641_v57 = vadd.s32 %v1856_v8, %v623_v30  ;;  %v640_v50 = vadd.s32 %v1856_v8, %v622_v37  ;;  %v643_v54 = vadd.s32 %v1856_v8, %v625_v43 }
 0x10c   :  { %v642_v51 = vadd.s32 %v1856_v8, %v624_v56  ;;  %v1926_v48 = vadd.s32 %v1856_v8, %v627_v60  ;;  %v1929_v55 = vadd.s32 %v1856_v8, %v626_v28  ;;  %v1951_v58 = vadd.s32 %v1856_v8, %v629_v63  ;;  %v871_v56 = vld [vmem:[#allocation3 + $0x40] sm:$0xff] }
 0x10d   :  { %v1985_v46 = vadd.s32 %v1856_v8, %v628_v29 }
 0x10e   :  { %993 = vperm.xlu1 %1389, %v1537_v10   ;;  %997 = vperm.xlu0 %1388, %v1539_v11   ;;  %v690_v10 = vsub.s32 0, %v1850_v4  ;;  %v619_v11 = vadd.s32 24, %v1850_v4 }
 0x110   :  { %v637_v2 = vadd.s32 %v1856_v8, %v619_v11 }
 0x112   :  { %1001 = vperm.xlu1 %1389, %v1541_v12   ;;  %1005 = vperm.xlu0 %1388, %v1546_v13   ;;  %v617_v12 = vadd.s32 8, %v1850_v4  ;;  %v1865_v13 = vadd.s32 %v653_v9, %v651_v5 }
 0x114   :  { %v635_v21 = vadd.s32 %v1856_v8, %v617_v12  ;;  %vm2496_vm0 = vcmp.lt.s32.totalorder %v1865_v13, 8  ;;  %vm658_vm3 = vcmp.gt.s32.totalorder %v1865_v13, %v637_v2  ;;  %vm659_vm10 = vcmp.gt.s32.totalorder %v1865_v13, %v638_v45  ;;  %v791_v45 = vld [vmem:[#allocation2 + $0x18] sm:$0xff] }
 0x115   :  { %vm1911_vm9 = vmand %vm658_vm3, %vm2496_vm0  ;;  %vm662_vm12 = vcmp.gt.s32.totalorder %v1865_v13, %v641_v57  ;;  %vm661_vm15 = vcmp.gt.s32.totalorder %v1865_v13, %v640_v50 }
 0x116   :  { %1009 = vperm.xlu1 %1389, %v1548_v14   ;;  %1013 = vperm.xlu0 %1388, %v1550_v15   ;;  %v634_v14 = vadd.s32 %v1856_v8, %v1850_v4  ;;  %v621_v15 = vadd.s32 40, %v1850_v4  ;;  %vm656_vm5 = vcmp.gt.s32.totalorder %v1865_v13, %v635_v21  ;;  %v2518_v18 = vsel %vm1911_vm9, 4294967295, %v2517_v18  ;;  %v870_v4 = vld [vmem:[#allocation3 + $0x10] sm:$0xff] }
 0x117   :  { %vm1920_vm11 = vmand %vm656_vm5, %vm2496_vm0 }
 0x118   :  { %vm655_vm1 = vcmp.gt.s32.totalorder %v1865_v13, %v634_v14  ;;  %v639_v22 = vadd.s32 %v1856_v8, %v621_v15  ;;  %vm1959_vm5 = vmand %vm659_vm10, %vm2496_vm0  ;;  %v2012_v14 = vadd.s32 %v1856_v8, %v631_v6  ;;  %v2015_v15 = vadd.s32 %v1856_v8, %v630_v27 }
 0x119   :  { %vm1893_vm4 = vmand %vm655_vm1, %vm2496_vm0 }
 0x11a   :  { %1017 = vperm.xlu1 %1389, %v1563_v16   ;;  %1021 = vperm.xlu0 %1388, %v1565_v17   ;;  %v636_v17 = vadd.s32 %v1856_v8, %v618_v7  ;;  %v2514_v62 = vsel %vm1893_vm4, 4294967295, %v2513_v62  ;;  %vm660_vm7 = vcmp.gt.s32.totalorder %v1865_v13, %v639_v22  ;;  %vm1976_vm10 = vmand %vm662_vm12, %vm2496_vm0 }
 0x11b   :  { %vm1937_vm14 = vmand %vm660_vm7, %vm2496_vm0 }
 0x11c   :  { %vm657_vm2 = vcmp.gt.s32.totalorder %v1865_v13, %v636_v17  ;;  %v2522_v35 = vsel %vm1937_vm14, 4294967295, %v2521_v35  ;;  %v868_v17 = vld [vmem:[#allocation3 + $0x28] sm:$0xff] }
 0x11d   :  { %vm1902_vm6 = vmand %vm657_vm2, %vm2496_vm0 }
 0x11e   :  { %1025 = vperm.xlu1 %1389, %v2511_v20   ;;  %1029 = vperm.xlu0 %1388, %v1569_v19   ;;  %v2512_v19 = vld [vmem:[#allocation14_spill] sm:$0xff]  ;;  %v2516_v25 = vsel %vm1902_vm6, 4294967295, %v2515_v25 }
 0x11f   :  { %v1872_v31 = vrot.slane %v2512_v19, %v690_v10  ;;  %v2031_v37 = vrot.slane %v2512_v19, %v966_v52 }
 0x15c   :  { %v705_v16 = vpop.permute.xlu1 %704  ;;  %v695_v42 = vpop.permute.xlu0 %694 }
 0x15d   :  { %v774_v44 = vsub.f32 %v1872_v31, %v705_v16  ;;  %v772_v61 = vsub.f32 %v1872_v31, %v695_v42  ;;  %v788_v16 = vld [vmem:[#allocation2 + $0x30] sm:$0xff] }
 0x15f   :  { %vm886_vm8 = vcmp.gt.f32.partialorder %v774_v44, 0.0  ;;  %v806_v33 = vmax.f32 %v774_v44, 0.0  ;;  %vm884_vm13 = vcmp.gt.f32.partialorder %v772_v61, 0.0  ;;  %v804_v47 = vmax.f32 %v772_v61, 0.0 }
 0x160   :  { %v710_v38 = vpop.permute.xlu1 %709  ;;  %v700_v39 = vpop.permute.xlu0 %699  ;;  %vm1945_vm1 = vmand %vm1902_vm6, %vm886_vm8 }
 0x161   :  { %v775_v0 = vsub.f32 %v1872_v31, %v710_v38  ;;  %v773_v26 = vsub.f32 %v1872_v31, %v700_v39  ;;  %vm1968_vm8 = vmand %vm1893_vm4, %vm884_vm13  ;;  %v822_v5 = vsel %vm1902_vm6, %v806_v33, 0.0  ;;  %v918_v7 = vsel %vm1945_vm1, 1, %v2503_v40  ;;  %v872_v38 = vld [vmem:[#allocation3 + $0x48] sm:$0xff] }
 0x162   :  { %vm1997_vm13 = vmand %vm661_vm15, %vm2496_vm0  ;;  %v820_v42 = vsel %vm1893_vm4, %v804_v47, 0.0  ;;  %v916_v24 = vsel %vm1968_vm8, 1, %v2503_v40  ;;  %vm2535_vm15 = vcmp.gt.s32.totalorder %v1865_v13, %v643_v54  ;;  %v2033_v22 = vadd.f32 %v822_v5, %v790_v3  ;;  %v797_v47 = vld [vmem:[#allocation2 + $0x20] sm:$0xff] }
 0x163   :  { %vm887_vm3 = vcmp.gt.f32.partialorder %v775_v0, 0.0  ;;  %v807_v1 = vmax.f32 %v775_v0, 0.0  ;;  %vm885_vm12 = vcmp.gt.f32.partialorder %v773_v26, 0.0  ;;  %v805_v2 = vmax.f32 %v773_v26, 0.0  ;;  %v789_v0 = vld [vmem:[#allocation2] sm:$0xff] }
 0x164   :  { %v720_v34 = vpop.permute.xlu1 %719  ;;  %v715_v32 = vpop.permute.xlu0 %714  ;;  %vm2004_vm2 = vmand %vm1911_vm9, %vm887_vm3  ;;  %v2035_v43 = vadd.s32 %v918_v7, %v870_v4  ;;  %vm2540_vm1 = vcmp.gt.s32.totalorder %v1865_v13, %v642_v51  ;;  %v2059_v61 = vadd.f32 %v820_v42, %v788_v16  ;;  %v2061_v50 = vadd.s32 %v916_v24, %v868_v17 }
 0x165   :  { %v777_v9 = vsub.f32 %v1872_v31, %v720_v34  ;;  %v776_v12 = vsub.f32 %v1872_v31, %v715_v32  ;;  %vm2026_vm3 = vmand %vm2535_vm15, %vm2496_vm0  ;;  %v823_v44 = vsel %vm1911_vm9, %v807_v1, 0.0  ;;  %v919_v19 = vsel %vm2004_vm2, 1, %v2503_v40  ;;  %v869_v34 = vld [vmem:[#allocation3 + $0x68] sm:$0xff] }
 0x166   :  { %vm2042_vm8 = vmand %vm1920_vm11, %vm885_vm12  ;;  %vm2543_vm2 = vcmp.gt.s32.totalorder %v1865_v13, %v1926_v48  ;;  %v821_v32 = vsel %vm1920_vm11, %v805_v2, 0.0  ;;  %v2090_v6 = vadd.f32 %v823_v44, %v791_v45  ;;  %v2092_v27 = vadd.s32 %v919_v19, %v871_v56 }
 0x167   :  { %v809_v57 = vmax.f32 %v777_v9, 0.0  ;;  %vm2055_vm12 = vmand %vm2540_vm1, %vm2496_vm0  ;;  %v917_v51 = vsel %vm2042_vm8, 1, %v2503_v40  ;;  %v808_v29 = vmax.f32 %v776_v12, 0.0  ;;  %vm2546_vm1 = vcmp.gt.s32.totalorder %v1865_v13, %v1929_v55 }
 0x168   :  { %v730_v59 = vpop.permute.xlu1 %729  ;;  %v725_v23 = vpop.permute.xlu0 %724  ;;  %vm2069_vm15 = vmand %vm2543_vm2, %vm2496_vm0  ;;  %vm2549_vm8 = vcmp.gt.f32.partialorder %v777_v9, 0.0  ;;  %v2116_v3 = vadd.f32 %v821_v32, %v789_v0  ;;  %v2118_v4 = vadd.s32 %v917_v51, %v869_v34  ;;  %v2557_v7 = vmov 0  ;;  %v873_v9 = vld [vmem:[#allocation3 + $0x30] sm:$0xff]  ;;  %v875_v34 = vld [vmem:[#allocation3 + $0x38] sm:$0xff] }
 0x169   :  { %v779_v39 = vsub.f32 %v1872_v31, %v730_v59  ;;  %v778_v60 = vsub.f32 %v1872_v31, %v725_v23  ;;  %vm2086_vm2 = vmand %vm2546_vm1, %vm2496_vm0  ;;  %v793_v23 = vld [vmem:[#allocation2 + $0x68] sm:$0xff]  ;;  %v825_v55 = vsel %vm1937_vm14, %v809_v57, 0.0  ;;  %vm2552_vm1 = vcmp.gt.f32.partialorder %v776_v12, 0.0  ;;  %v792_v12 = vld [vmem:[#allocation2 + $0x50] sm:$0xff] }
 0x16a   :  { %vm2097_vm7 = vmand %vm1937_vm14, %vm2549_vm8  ;;  %vm2555_vm14 = vcmp.lt.s32.totalorder %v1865_v13, 8  ;;  %v824_v16 = vsel %vm1959_vm5, %v808_v29, 0.0  ;;  %v2142_v2 = vadd.f32 %v825_v55, %v793_v23  ;;  %v794_v32 = vld [vmem:[#allocation2 + $0x8] sm:$0xff] }
 0x16b   :  { %vm2107_vm0 = vmand %vm1959_vm5, %vm2552_vm1  ;;  %v811_v41 = vmax.f32 %v779_v39, 0.0  ;;  %vm890_vm6 = vcmp.gt.f32.partialorder %v778_v60, 0.0  ;;  %v810_v5 = vmax.f32 %v778_v60, 0.0  ;;  %vm2556_vm1 = vcmp.gt.s32.totalorder %v1865_v13, %v1951_v58 }
 0x16c   :  { %v740_v30 = vpop.permute.xlu1 %739  ;;  %v735_v8 = vpop.permute.xlu0 %734  ;;  %vm2125_vm4 = vmand %vm2556_vm1, %vm2555_vm14  ;;  %v921_v11 = vsel %vm2097_vm7, 1, %v2503_v40  ;;  %vm2559_vm8 = vcmp.gt.f32.partialorder %v779_v39, 0.0  ;;  %v795_v39 = vld [vmem:[#allocation2 + $0x48] sm:$0xff]  ;;  %v2168_v0 = vadd.f32 %v824_v16, %v792_v12  ;;  %v796_v12 = vld [vmem:[#allocation2 + $0x40] sm:$0xff] }
 0x16d   :  { %v781_v54 = vsub.f32 %v1872_v31, %v740_v30  ;;  %v2079_v33 = vsub.f32 %v1872_v31, %v735_v8  ;;  %v2558_v7 = vsel %vm2125_vm4, 4294967295, %v2557_v7  ;;  %vm2137_vm9 = vmand %vm1976_vm10, %vm2559_vm8  ;;  %v920_v30 = vsel %vm2107_vm0, 1, %v2503_v40  ;;  %v799_v8 = vld [vmem:[#allocation2 + $0x38] sm:$0xff] }
 0x16e   :  { %vm2150_vm7 = vmand %vm1997_vm13, %vm890_vm6  ;;  %v827_v45 = vsel %vm1976_vm10, %v811_v41, 0.0  ;;  %v2166_v60 = vadd.s32 %v921_v11, %v873_v9  ;;  %v826_v51 = vsel %vm1997_vm13, %v810_v5, 0.0  ;;  %v2196_v5 = vadd.s32 %v920_v30, %v872_v38  ;;  %v877_v11 = vld [vmem:[#allocation3 + $0x78] sm:$0xff] }
 0x16f   :  { %v813_v58 = vmax.f32 %v781_v54, 0.0  ;;  %vm2564_vm1 = vcmp.gt.f32.partialorder %v781_v54, 0.0  ;;  %v812_v19 = vmax.f32 %v2079_v33, 0.0  ;;  %v923_v54 = vsel %vm2137_vm9, 1, %v2503_v40 }
 0x170   :  { %v750_v26 = vpop.permute.xlu1 %749  ;;  %v745_v36 = vpop.permute.xlu0 %744  ;;  %vm2160_vm14 = vmand %vm2026_vm3, %vm2564_vm1  ;;  %vm2567_vm6 = vcmp.gt.f32.partialorder %v2079_v33, 0.0  ;;  %v2198_v9 = vadd.f32 %v827_v45, %v795_v39  ;;  %v2221_v39 = vadd.s32 %v923_v54, %v875_v34  ;;  %v2223_v45 = vadd.f32 %v826_v51, %v794_v32  ;;  %v798_v54 = vld [vmem:[#allocation2 + $0x10] sm:$0xff]  ;;  %v878_v32 = vld [vmem:[#allocation3 + $0x18] sm:$0xff] }
 0x171   :  { %v783_v59 = vsub.f32 %v1872_v31, %v750_v26  ;;  %v2112_v1 = vsub.f32 %v1872_v31, %v745_v36  ;;  %vm2179_vm1 = vmand %vm2055_vm12, %vm2567_vm6  ;;  %v874_v26 = vld [vmem:[#allocation3 + $0x70] sm:$0xff]  ;;  %v922_v36 = vsel %vm2150_vm7, 1, %v2503_v40  ;;  %v829_v23 = vsel %vm2026_vm3, %v813_v58, 0.0  ;;  %v876_v58 = vld [vmem:[#allocation3 + $0x20] sm:$0xff] }
 0x172   :  { %v924_v30 = vsel %vm2179_vm1, 1, %v2503_v40  ;;  %v2225_v56 = vadd.s32 %v922_v36, %v874_v26 }
 0x173   :  { %vm895_vm8 = vcmp.gt.f32.partialorder %v783_v59, 0.0  ;;  %v815_v57 = vmax.f32 %v783_v59, 0.0  ;;  %vm894_vm0 = vcmp.gt.f32.partialorder %v2112_v1, 0.0  ;;  %v814_v55 = vmax.f32 %v2112_v1, 0.0 }
 0x174   :  { %v760_v42 = vpop.permute.xlu1 %759  ;;  %v755_v24 = vpop.permute.xlu0 %754  ;;  %vm2191_vm9 = vmand %vm2069_vm15, %vm895_vm8  ;;  %v925_v59 = vsel %vm2160_vm14, 1, %v2503_v40  ;;  %v879_v40 = vld [vmem:[#allocation3 + $0x58] sm:$0xff]  ;;  %v2248_v36 = vadd.s32 %v924_v30, %v876_v58  ;;  %vm2577_vm8 = vcmp.lt.s32.totalorder %v1865_v13, 8 }
 0x175   :  { %v785_v44 = vsub.f32 %v1872_v31, %v760_v42  ;;  %vm2207_vm7 = vmand %vm2086_vm2, %vm894_vm0  ;;  %v2212_v17 = vsub.f32 %v1872_v31, %v755_v24  ;;  %v828_v42 = vsel %vm2055_vm12, %v812_v19, 0.0  ;;  %v831_v1 = vsel %vm2069_vm15, %v815_v57, 0.0 }
 0x176   :  { %v2227_v24 = vadd.f32 %v829_v23, %v797_v47  ;;  %v2236_v29 = vadd.s32 %v925_v59, %v877_v11  ;;  %v2576_v57 = vmov 0   ;;  %v830_v51 = vsel %vm2086_vm2, %v814_v55, 0.0  ;;  %v801_v11 = vld [vmem:[#allocation2 + $0x70] sm:$0xff]  ;;  %v881_v59 = vld [vmem:[#allocation3 + $0x8] sm:$0xff] }
 0x177   :  { %vm897_vm6 = vcmp.gt.f32.partialorder %v785_v44, 0.0  ;;  %v817_v38 = vmax.f32 %v785_v44, 0.0  ;;  %v927_v34 = vsel %vm2191_vm9, 1, %v2576_v57  ;;  %v926_v44 = vsel %vm2207_vm7, 1, %v2576_v57 }
 0x178   :  { %v770_v52 = vpop.permute.xlu1 %769  ;;  %v765_v41 = vpop.permute.xlu0 %764  ;;  %vm2232_vm14 = vmand %vm2125_vm4, %vm897_vm6  ;;  %v2246_v26 = vadd.f32 %v828_v42, %v796_v12  ;;  %v2250_v47 = vadd.f32 %v831_v1, %v799_v8  ;;  %vm2578_vm0 = vcmp.gt.s32.totalorder %v1865_v13, %v1985_v46  ;;  %vm896_vm9 = vcmp.gt.f32.partialorder %v2212_v17, 0.0 }
 0x179   :  { %vm2257_vm1 = vmand %vm2578_vm0, %vm2577_vm8  ;;  %v833_v12 = vsel %vm2125_vm4, %v817_v38, 0.0  ;;  %v929_v16 = vsel %vm2232_vm14, 1, %v2576_v57  ;;  %v2269_v42 = vadd.s32 %v927_v34, %v879_v40  ;;  %v2271_v30 = vadd.f32 %v830_v51, %v798_v54 }
 0x17a   :  { %v2273_v8 = vadd.s32 %v926_v44, %v878_v32  ;;  %v816_v1 = vmax.f32 %v2212_v17, 0.0  ;;  %vm2278_vm6 = vmand %vm2257_vm1, %vm896_vm9  ;;  %v2283_v19 = vsub.f32 %v1872_v31, %v770_v52  ;;  %v2288_v34 = vadd.f32 %v833_v12, %v801_v11 }
 0x17b   :  { %v2290_v54 = vadd.s32 %v929_v16, %v881_v59  ;;  %vm670_vm14 = vcmp.gt.s32.totalorder %v1865_v13, %v2012_v14  ;;  %vm2583_vm9 = vnez %v2514_v62 }
 0x17d   :  { %v974_v33 = vpop.permute.xlu1 %973  ;;  %v970_v55 = vpop.permute.xlu0 %969 }
 0x17e   :  { %v1033_v58 = vsub.f32 %v2031_v37, %v974_v33  ;;  %v1032_v46 = vsub.f32 %v2031_v37, %v970_v55  ;;  %v2286_v33 = vsub.f32 %v1872_v31, %v765_v41 }
 0x180   :  { %v1065_v40 = vmax.f32 %v1033_v58, 0.0  ;;  %vm1145_vm7 = vcmp.gt.f32.partialorder %v1033_v58, 0.0  ;;  %v1064_v17 = vmax.f32 %v1032_v46, 0.0  ;;  %vm1144_vm0 = vcmp.gt.f32.partialorder %v1032_v46, 0.0 }
 0x181   :  { %vm1161_vm8 = vmand %vm1920_vm11, %vm1145_vm7  ;;  %v978_v32 = vpop.permute.xlu1 %977  ;;  %v982_v52 = vpop.permute.xlu0 %981  ;;  %v832_v46 = vsel %vm2257_vm1, %v816_v1, 0.0 }
 0x182   :  { %v1081_v31 = vsel %vm1920_vm11, %v1065_v40, 0.0  ;;  %v1177_v41 = vsel %vm1161_vm8, 1, %v2576_v57  ;;  %vm1160_vm4 = vmand %vm2583_vm9, %vm1144_vm0  ;;  %v1034_v51 = vsub.f32 %v2031_v37, %v978_v32  ;;  %v1035_v44 = vsub.f32 %v2031_v37, %v982_v52  ;;  %v800_v40 = vld [vmem:[#allocation2 + $0x60] sm:$0xff] }
 0x183   :  { %v1097_v55 = vadd.f32 %v1081_v31, %v2116_v3  ;;  %v1193_v11 = vadd.s32 %v1177_v41, %v2118_v4  ;;  %v1080_v59 = vsel %vm2583_vm9, %v1064_v17, 0.0  ;;  %v1176_v12 = vsel %vm1160_vm4, 1, %v2576_v57 }
 0x184   :  { %vm669_vm11 = vcmp.gt.s32.totalorder %v1865_v13, %v2015_v15  ;;  %v1096_v53 = vadd.f32 %v1080_v59, %v2059_v61  ;;  %v1192_v16 = vadd.s32 %v1176_v12, %v2061_v50  ;;  %v1066_v58 = vmax.f32 %v1034_v51, 0.0  ;;  %v880_v50 = vld [vmem:[#allocation3] sm:$0xff] }
 0x185   :  { %vm1146_vm7 = vcmp.gt.f32.partialorder %v1034_v51, 0.0  ;;  %v928_v3 = vsel %vm2278_vm6, 1, %v2576_v57  ;;  %1113 = vst [vmem:[#allocation2] sm:$0xff] %v1097_v55  ;;  %1209 = vst [vmem:[#allocation3 + $0x68] sm:$0xff] %v1193_v11  ;;  %vm2584_vm4 = vnez %v2516_v25  ;;  %v1067_v62 = vmax.f32 %v1035_v44, 0.0  ;;  %v986_v4 = vpop.permute.xlu1 %985  ;;  %v990_v61 = vpop.permute.xlu0 %989 }
 0x186   :  { %vm1162_vm8 = vmand %vm2584_vm4, %vm1146_vm7  ;;  %vm1147_vm0 = vcmp.gt.f32.partialorder %v1035_v44, 0.0  ;;  %1112 = vst [vmem:[#allocation2 + $0x30] sm:$0xff] %v1096_v53  ;;  %v1082_v1 = vsel %vm2584_vm4, %v1066_v58, 0.0  ;;  %vm2585_vm6 = vnez %v2518_v18  ;;  %v1036_v38 = vsub.f32 %v2031_v37, %v986_v4 }
 0x187   :  { %1208 = vst [vmem:[#allocation3 + $0x28] sm:$0xff] %v1192_v16  ;;  %v1178_v17 = vsel %vm1162_vm8, 1, %v2576_v57  ;;  %vm1163_vm9 = vmand %vm2585_vm6, %vm1147_vm0  ;;  %v1037_v32 = vsub.f32 %v2031_v37, %v990_v61  ;;  %v1098_v52 = vadd.f32 %v1082_v1, %v2033_v22  ;;  %v1083_v41 = vsel %vm2585_vm6, %v1067_v62, 0.0 }
 0x188   :  { %v1194_v31 = vadd.s32 %v1178_v17, %v2035_v43  ;;  %v1179_v51 = vsel %vm1163_vm9, 1, %v2576_v57  ;;  %v1099_v25 = vadd.f32 %v1083_v41, %v2090_v6  ;;  %v1068_v55 = vmax.f32 %v1036_v38, 0.0 }
 0x189   :  { %v1195_v44 = vadd.s32 %v1179_v51, %v2092_v27  ;;  %vm1148_vm7 = vcmp.gt.f32.partialorder %v1036_v38, 0.0  ;;  %v2333_v11 = vadd.f32 %v832_v46, %v800_v40  ;;  %v2335_v59 = vadd.s32 %v928_v3, %v880_v50  ;;  %1114 = vst [vmem:[#allocation2 + $0x58] sm:$0xff] %v1098_v52  ;;  %v994_v18 = vpop.permute.xlu1 %993  ;;  %v998_v43 = vpop.permute.xlu0 %997 }
 0x18a   :  { %1210 = vst [vmem:[#allocation3 + $0x10] sm:$0xff] %v1194_v31  ;;  %vm1164_vm4 = vmand %vm1959_vm5, %vm1148_vm7  ;;  %v1069_v22 = vmax.f32 %v1037_v32, 0.0  ;;  %vm1149_vm8 = vcmp.gt.f32.partialorder %v1037_v32, 0.0  ;;  %v1084_v6 = vsel %vm1959_vm5, %v1068_v55, 0.0  ;;  %vm2586_vm0 = vnez %v2522_v35 }
 0x18b   :  { %1115 = vst [vmem:[#allocation2 + $0x18] sm:$0xff] %v1099_v25  ;;  %1211 = vst [vmem:[#allocation3 + $0x40] sm:$0xff] %v1195_v44  ;;  %v1180_v27 = vsel %vm1164_vm4, 1, %v2576_v57  ;;  %v1038_v12 = vsub.f32 %v2031_v37, %v994_v18  ;;  %v1039_v53 = vsub.f32 %v2031_v37, %v998_v43  ;;  %v1100_v16 = vadd.f32 %v1084_v6, %v2168_v0 }
 0x18c   :  { %vm1165_vm6 = vmand %vm2586_vm0, %vm1149_vm8  ;;  %v1196_v58 = vadd.s32 %v1180_v27, %v2196_v5  ;;  %v1085_v46 = vsel %vm2586_vm0, %v1069_v22, 0.0  ;;  %vm2587_vm5 = vcmp.lt.s32.totalorder %v1865_v13, 8  ;;  %v819_v35 = vmax.f32 %v2283_v19, 0.0 }
 0x18d   :  { %v1181_v3 = vsel %vm1165_vm6, 1, %v2576_v57  ;;  %vm2356_vm9 = vmand %vm670_vm14, %vm2587_vm5  ;;  %v1101_v62 = vadd.f32 %v1085_v46, %v2142_v2  ;;  %v1070_v4 = vmax.f32 %v1038_v12, 0.0  ;;  %vm1150_vm7 = vcmp.gt.f32.partialorder %v1038_v12, 0.0  ;;  %1116 = vst [vmem:[#allocation2 + $0x50] sm:$0xff] %v1100_v16  ;;  %v1002_v5 = vpop.permute.xlu1 %1001  ;;  %v1006_v61 = vpop.permute.xlu0 %1005 }
 0x18e   :  { %v1197_v0 = vadd.s32 %v1181_v3, %v2166_v60  ;;  %vm899_vm4 = vcmp.gt.f32.partialorder %v2283_v19, 0.0  ;;  %1212 = vst [vmem:[#allocation3 + $0x48] sm:$0xff] %v1196_v58  ;;  %vm1166_vm8 = vmand %vm1997_vm13, %vm1150_vm7  ;;  %v1071_v14 = vmax.f32 %v1039_v53, 0.0  ;;  %vm1151_vm14 = vcmp.gt.f32.partialorder %v1039_v53, 0.0 }
 0x18f   :  { %1117 = vst [vmem:[#allocation2 + $0x68] sm:$0xff] %v1101_v62  ;;  %v1086_v2 = vsel %vm1997_vm13, %v1070_v4, 0.0  ;;  %v1182_v60 = vsel %vm1166_vm8, 1, %v2576_v57  ;;  %vm1167_vm0 = vmand %vm1976_vm10, %vm1151_vm14  ;;  %v1040_v40 = vsub.f32 %v2031_v37, %v1002_v5  ;;  %v1041_v50 = vsub.f32 %v2031_v37, %v1006_v61 }
 0x190   :  { %1213 = vst [vmem:[#allocation3 + $0x30] sm:$0xff] %v1197_v0  ;;  %vm2590_vm6 = vmmov %vm2587_vm5  ;;  %v1102_v10 = vadd.f32 %v1086_v2, %v2223_v45  ;;  %v1198_v17 = vadd.s32 %v1182_v60, %v2225_v56  ;;  %v1087_v38 = vsel %vm1976_vm10, %v1071_v14, 0.0  ;;  %v1183_v32 = vsel %vm1167_vm0, 1, %v2576_v57  ;;  %v803_v60 = vld [vmem:[#allocation2 + $0x28] sm:$0xff] }
 0x191   :  { %vm2378_vm5 = vmand %vm669_vm11, %vm2590_vm6  ;;  %v1103_v13 = vadd.f32 %v1087_v38, %v2198_v9  ;;  %v1199_v15 = vadd.s32 %v1183_v32, %v2221_v39  ;;  %v1072_v45 = vmax.f32 %v1040_v40, 0.0  ;;  %vm1152_vm11 = vcmp.gt.f32.partialorder %v1040_v40, 0.0  ;;  %v1010_v19 = vpop.permute.xlu1 %1009  ;;  %v1014_v31 = vpop.permute.xlu0 %1013  ;;  %v883_v40 = vld [vmem:[#allocation3 + $0x50] sm:$0xff] }
 0x192   :  { %vm2391_vm13 = vmand %vm2356_vm9, %vm899_vm4  ;;  %v818_v56 = vmax.f32 %v2286_v33, 0.0  ;;  %vm898_vm10 = vcmp.gt.f32.partialorder %v2286_v33, 0.0  ;;  %1118 = vst [vmem:[#allocation2 + $0x8] sm:$0xff] %v1102_v10  ;;  %v1073_v20 = vmax.f32 %v1041_v50, 0.0  ;;  %vm1153_vm4 = vcmp.gt.f32.partialorder %v1041_v50, 0.0 }
 0x193   :  { %1214 = vst [vmem:[#allocation3 + $0x70] sm:$0xff] %v1198_v17  ;;  %vm1168_vm7 = vmand %vm2055_vm12, %vm1152_vm11  ;;  %v1088_v9 = vsel %vm2055_vm12, %v1072_v45, 0.0  ;;  %v1042_v41 = vsub.f32 %v2031_v37, %v1010_v19  ;;  %v1043_v51 = vsub.f32 %v2031_v37, %v1014_v31  ;;  %v835_v21 = vsel %vm2356_vm9, %v819_v35, 0.0  ;;  %v802_v35 = vld [vmem:[#allocation2 + $0x78] sm:$0xff] }
 0x194   :  { %1119 = vst [vmem:[#allocation2 + $0x48] sm:$0xff] %v1103_v13  ;;  %1215 = vst [vmem:[#allocation3 + $0x38] sm:$0xff] %v1199_v15  ;;  %v1184_v39 = vsel %vm1168_vm7, 1, %v2576_v57  ;;  %v1104_v25 = vadd.f32 %v1088_v9, %v2246_v26  ;;  %v1089_v55 = vsel %vm2026_vm3, %v1073_v20, 0.0  ;;  %v834_v4 = vsel %vm2378_vm5, %v818_v56, 0.0 }
 0x195   :  { %vm1169_vm8 = vmand %vm2026_vm3, %vm1153_vm4  ;;  %v1200_v44 = vadd.s32 %v1184_v39, %v2248_v36  ;;  %v1105_v18 = vadd.f32 %v1089_v55, %v2227_v24  ;;  %v1074_v26 = vmax.f32 %v1042_v41, 0.0  ;;  %vm1154_vm14 = vcmp.gt.f32.partialorder %v1042_v41, 0.0  ;;  %v1018_v6 = vpop.permute.xlu1 %1017  ;;  %v1022_v24 = vpop.permute.xlu0 %1021 }
 0x196   :  { %v1185_v22 = vsel %vm1169_vm8, 1, %v2576_v57  ;;  %vm2417_vm12 = vmand %vm2378_vm5, %vm898_vm10  ;;  %v931_v36 = vsel %vm2391_vm13, 1, %v2576_v57  ;;  %1120 = vst [vmem:[#allocation2 + $0x40] sm:$0xff] %v1104_v25  ;;  %v1075_v33 = vmax.f32 %v1043_v51, 0.0  ;;  %vm1155_vm0 = vcmp.gt.f32.partialorder %v1043_v51, 0.0 }
 0x197   :  { %v1201_v43 = vadd.s32 %v1185_v22, %v2236_v29  ;;  %1216 = vst [vmem:[#allocation3 + $0x20] sm:$0xff] %v1200_v44  ;;  %vm1170_vm3 = vmand %vm2086_vm2, %vm1154_vm14  ;;  %v1090_v29 = vsel %vm2086_vm2, %v1074_v26, 0.0  ;;  %v1044_v12 = vsub.f32 %v2031_v37, %v1018_v6  ;;  %v1045_v53 = vsub.f32 %v2031_v37, %v1022_v24 }
 0x198   :  { %1121 = vst [vmem:[#allocation2 + $0x20] sm:$0xff] %v1105_v18  ;;  %v1186_v27 = vsel %vm1170_vm3, 1, %v2576_v57  ;;  %vm1171_vm6 = vmand %vm2069_vm15, %vm1155_vm0  ;;  %v1106_v16 = vadd.f32 %v1090_v29, %v2271_v30  ;;  %v1091_v46 = vsel %vm2069_vm15, %v1075_v33, 0.0  ;;  %v930_v30 = vsel %vm2417_vm12, 1, %v2576_v57 }
 0x199   :  { %1217 = vst [vmem:[#allocation3 + $0x78] sm:$0xff] %v1201_v43  ;;  %v1202_v58 = vadd.s32 %v1186_v27, %v2273_v8  ;;  %v1187_v3 = vsel %vm1171_vm6, 1, %v2576_v57  ;;  %v1107_v48 = vadd.f32 %v1091_v46, %v2250_v47  ;;  %v1076_v0 = vmax.f32 %v1044_v12, 0.0  ;;  %v1026_v8 = vpop.permute.xlu1 %1025  ;;  %v1030_v47 = vpop.permute.xlu0 %1029 }
 0x19a   :  { %v1203_v62 = vadd.s32 %v1187_v3, %v2269_v42  ;;  %vm1156_vm2 = vcmp.gt.f32.partialorder %v1044_v12, 0.0  ;;  %1122 = vst [vmem:[#allocation2 + $0x10] sm:$0xff] %v1106_v16  ;;  %v1077_v63 = vmax.f32 %v1045_v53, 0.0  ;;  %vm1157_vm13 = vcmp.gt.f32.partialorder %v1045_v53, 0.0  ;;  %v882_v42 = vld [vmem:[#allocation3 + $0x60] sm:$0xff] }
 0x19b   :  { %1218 = vst [vmem:[#allocation3 + $0x18] sm:$0xff] %v1202_v58  ;;  %vm1172_vm15 = vmand %vm2257_vm1, %vm1156_vm2  ;;  %v1092_v14 = vsel %vm2257_vm1, %v1076_v0, 0.0  ;;  %vm2597_vm11 = vnez %v2558_v7  ;;  %v1046_v61 = vsub.f32 %v2031_v37, %v1026_v8  ;;  %v1047_v2 = vsub.f32 %v2031_v37, %v1030_v47 }
 0x19c   :  { %1123 = vst [vmem:[#allocation2 + $0x38] sm:$0xff] %v1107_v48  ;;  %1219 = vst [vmem:[#allocation3 + $0x58] sm:$0xff] %v1203_v62  ;;  %v1188_v5 = vsel %vm1172_vm15, 1, %v2576_v57  ;;  %v1108_v50 = vadd.f32 %v1092_v14, %v2333_v11  ;;  %v1093_v17 = vsel %vm2597_vm11, %v1077_v63, 0.0  ;;  %v850_v13 = vadd.f32 %v834_v4, %v802_v35 }
 0x19d   :  { %vm1173_vm10 = vmand %vm2597_vm11, %vm1157_vm13  ;;  %v1204_v10 = vadd.s32 %v1188_v5, %v2335_v59  ;;  %v1109_v38 = vadd.f32 %v1093_v17, %v2288_v34  ;;  %v1078_v52 = vmax.f32 %v1046_v61, 0.0  ;;  %vm1158_vm1 = vcmp.gt.f32.partialorder %v1046_v61, 0.0 }
 0x19e   :  { %v1189_v23 = vsel %vm1173_vm10, 1, %v2576_v57  ;;  %v946_v15 = vadd.s32 %v930_v30, %v882_v42  ;;  %1124 = vst [vmem:[#allocation2 + $0x60] sm:$0xff] %v1108_v50  ;;  %vm1174_vm7 = vmand %vm2378_vm5, %vm1158_vm1  ;;  %v1079_v37 = vmax.f32 %v1047_v2, 0.0  ;;  %vm1159_vm4 = vcmp.gt.f32.partialorder %v1047_v2, 0.0 }
 0x19f   :  { %v1205_v32 = vadd.s32 %v1189_v23, %v2290_v54  ;;  %1220 = vst [vmem:[#allocation3] sm:$0xff] %v1204_v10  ;;  %v851_v11 = vadd.f32 %v835_v21, %v803_v60  ;;  %v947_v7 = vadd.s32 %v931_v36, %v883_v40  ;;  %1125 = vst [vmem:[#allocation2 + $0x70] sm:$0xff] %v1109_v38  ;;  %v1094_v34 = vsel %vm2378_vm5, %v1078_v52, 0.0 }
 0x1a0   :  { %v1190_v54 = vsel %vm1174_vm7, 1, %v2576_v57  ;;  %vm1175_vm8 = vmand %vm2356_vm9, %vm1159_vm4  ;;  %v1110_v59 = vadd.f32 %v1094_v34, %v850_v13  ;;  %v1095_v56 = vsel %vm2356_vm9, %v1079_v37, 0.0 }
 0x1a1   :  { %1221 = vst [vmem:[#allocation3 + $0x8] sm:$0xff] %v1205_v32  ;;  %v1206_v45 = vadd.s32 %v1190_v54, %v946_v15  ;;  %v1191_v20 = vsel %vm1175_vm8, 1, %v2576_v57  ;;  %v1111_v19 = vadd.f32 %v1095_v56, %v851_v11 }
 0x1a2   :  { %v1207_v31 = vadd.s32 %v1191_v20, %v947_v7  ;;  %1126 = vst [vmem:[#allocation2 + $0x78] sm:$0xff] %v1110_v59 }
 0x1a3   :  { %1222 = vst [vmem:[#allocation3 + $0x60] sm:$0xff] %v1206_v45  ;;  %1127 = vst [vmem:[#allocation2 + $0x28] sm:$0xff] %v1111_v19 }
 0x1a4   :  { %1223 = vst [vmem:[#allocation3 + $0x50] sm:$0xff] %v1207_v31 }
 0x1a5 PF:  { %v1270_v1 = vld [vmem:[#allocation3 + $0x28] sm:$0xff]  ;;  %v1272_v39 = vld [vmem:[#allocation3 + $0x10] sm:$0xff]  ;;  %v1273_v41 = vld [vmem:[#allocation3 + $0x40] sm:$0xff]  ;;  %s1440_s0 = smov [#allocation8]   ;;  %s1441_s19 = smov [#allocation10]   ;;  %vm1268_vm9 = vcmask 0  }
 0x1a6   :  { %v1271_v9 = vld [vmem:[#allocation3 + $0x68] sm:$0xff]  ;;  %v1275_v25 = vld [vmem:[#allocation3 + $0x30] sm:$0xff]  ;;  %v1277_v55 = vld [vmem:[#allocation3 + $0x38] sm:$0xff]  ;;  %s1328_s1 = sshll.u32 %s1440_s0, 4  ;;  %s1338_s20 = sshll.u32 %s1441_s19, 4  ;;  %s1329_s1 = int_to_ptr.vmem [resolvable:$true] %s1328_s1  ;;  %s1339_s20 = int_to_ptr.vmem [resolvable:$true] %s1338_s20 }
 0x1a7   :  { %v1274_v51 = vld [vmem:[#allocation3 + $0x48] sm:$0xff]  ;;  %v1276_v44 = vld [vmem:[#allocation3 + $0x70] sm:$0xff]  ;;  %v1278_v22 = vld [vmem:[#allocation3 + $0x20] sm:$0xff]  ;;  %v1287_v28 = vadd.s32 %v1275_v25, %v1271_v9  ;;  %v1289_v21 = vadd.s32 %v1277_v55, %v1273_v41  ;;  %s1390_s24 = scalar_lea.vmem %s1329_s1, 16  ;;  %s1394_s25 = scalar_lea.vmem %s1329_s1, 32 }
 0x1a8   :  { %v1286_v49 = vadd.s32 %v1274_v51, %v1270_v1  ;;  %v1279_v18 = vld [vmem:[#allocation3 + $0x78] sm:$0xff]  ;;  %v1288_v26 = vadd.s32 %v1276_v44, %v1272_v39  ;;  %v1282_v36 = vld [vmem:[#allocation3] sm:$0xff]  ;;  %v1283_v33 = vld [vmem:[#allocation3 + $0x8] sm:$0xff]  ;;  %p1391_p9 = scmp.ne.s32.totalorder %s1329_s1, %s1390_s24  ;;  %p1395_p10 = scmp.lt.s32.totalorder %s1329_s1, %s1329_s1 }
 0x1a9   :  { %v1280_v57 = vld [vmem:[#allocation3 + $0x18] sm:$0xff]  ;;  %v1291_v29 = vadd.s32 %v1287_v28, %v1279_v18  ;;  %v1227_v16 = vld [vmem:[#allocation2 + $0x30] sm:$0xff]  ;;  %v1228_v58 = vld [vmem:[#allocation2] sm:$0xff]  ;;  %p1396_p11 = scmp.lt.s32.totalorder %s1394_s25, %s1390_s24 }
 0x1aa   :  { %v1281_v43 = vld [vmem:[#allocation3 + $0x58] sm:$0xff]  ;;  %v1284_v6 = vld [vmem:[#allocation3 + $0x60] sm:$0xff]  ;;  %v1290_v24 = vadd.s32 %v1286_v49, %v1278_v22  ;;  %v1292_v12 = vadd.s32 %v1288_v26, %v1280_v57  ;;  %v1243_v62 = vadd.f32 %v1228_v58, %v1227_v16  ;;  %v1231_v35 = vld [vmem:[#allocation2 + $0x50] sm:$0xff] }
 0x1ab   :  { %v1285_v27 = vld [vmem:[#allocation3 + $0x50] sm:$0xff]  ;;  %v1293_v53 = vadd.s32 %v1289_v21, %v1281_v43  ;;  %v1295_v3 = vadd.s32 %v1291_v29, %v1283_v33  ;;  %v1229_v48 = vld [vmem:[#allocation2 + $0x58] sm:$0xff]  ;;  %v1232_v5 = vld [vmem:[#allocation2 + $0x68] sm:$0xff]  ;;  %p1397_p12 = por %p1396_p11, %p1395_p10 }
 0x1ac   :  { %v1294_v46 = vadd.s32 %v1290_v24, %v1282_v36  ;;  %v1296_v0 = vadd.s32 %v1292_v12, %v1284_v6  ;;  %v1230_v30 = vld [vmem:[#allocation2 + $0x18] sm:$0xff]  ;;  %v1244_v8 = vadd.f32 %v1243_v62, %v1229_v48  ;;  %v1233_v40 = vld [vmem:[#allocation2 + $0x8] sm:$0xff]  ;;  %v1235_v32 = vld [vmem:[#allocation2 + $0x40] sm:$0xff] }
 0x1ad   :  { %v1297_v4 = vadd.s32 %v1293_v53, %v1285_v27  ;;  %v1234_v17 = vld [vmem:[#allocation2 + $0x48] sm:$0xff]  ;;  %v1236_v13 = vld [vmem:[#allocation2 + $0x20] sm:$0xff]  ;;  %v1237_v37 = vld [vmem:[#allocation2 + $0x10] sm:$0xff]  ;;  %p1398_p13 = pnand %p1397_p12, %p1391_p9 }
 0x1ae   :  { %v1298_v63 = vadd.s32 %v1295_v3, %v1294_v46  ;;  %v1245_v42 = vadd.f32 %v1244_v8, %v1230_v30  ;;  %v1238_v7 = vld [vmem:[#allocation2 + $0x38] sm:$0xff]  ;;  %v1239_v54 = vld [vmem:[#allocation2 + $0x60] sm:$0xff]  ;;  %v1240_v45 = vld [vmem:[#allocation2 + $0x70] sm:$0xff] }
 0x1af   :  { %v1299_v47 = vadd.s32 %v1297_v4, %v1296_v0  ;;  %v1241_v20 = vld [vmem:[#allocation2 + $0x78] sm:$0xff]  ;;  %v1242_v31 = vld [vmem:[#allocation2 + $0x28] sm:$0xff] }
 0x1b0   :  { %v1246_v61 = vadd.f32 %v1245_v42, %v1231_v35 }
 0x1b1   :  { %v1300_v14 = vadd.s32 %v1299_v47, %v1298_v63 }
 0x1b2   :  { %v1247_v50 = vadd.f32 %v1246_v61, %v1232_v5 }
 0x1b3   :  { %v1302_v2 = vshrl.u32 %v1300_v14, 16  ;;  %v1301_v60 = vand.u32 65535, %v1300_v14 }
 0x1b4   :  { %v1248_v23 = vadd.f32 %v1247_v50, %v1233_v40 }
 0x1b5   :  { %v1304_v10 = vcvt.s32.f32 %v1302_v2  ;;  %v1303_v38 = vcvt.s32.f32 %v1301_v60 }
 0x1b6   :  { %v1249_v52 = vadd.f32 %v1248_v23, %v1234_v17 }
 0x1b7   :  { %1307 = vadd.xlane.f32.xlu0 %v1304_v10 }
 0x1b8   :  { %v1250_v15 = vadd.f32 %v1249_v52, %v1235_v32 }
 0x1ba   :  { %v1251_v11 = vadd.f32 %v1250_v15, %v1236_v13 }
 0x1bb   :  { %1305 = vadd.xlane.f32.xlu0 %v1303_v38 }
 0x1bc   :  { %v1252_v34 = vadd.f32 %v1251_v11, %v1237_v37 }
 0x1be   :  { %v1253_v59 = vadd.f32 %v1252_v34, %v1238_v7 }
 0x1c0   :  { %v1254_v56 = vadd.f32 %v1253_v59, %v1239_v54 }
 0x1c2   :  { %v1255_v19 = vadd.f32 %v1254_v56, %v1240_v45 }
 0x1c4   :  { %v1256_v1 = vadd.f32 %v1255_v19, %v1241_v20 }
 0x1c6   :  { %v1257_v9 = vadd.f32 %v1256_v1, %v1242_v31 }
 0x1c8   :  { %1258 = vadd.xlane.f32.xlu1 %v1257_v9 }
 0x240   :  { %v1308_v39 = vpop.xlane.xlu0 %1307 }
 0x241   :  { %v1310_v41 = vcvt.f32.s32 %v1308_v39 }
 0x243   :  { %v1311_v51 = vshll.u32 %v1310_v41, 16 }
 0x244   :  { %v1306_v25 = vpop.xlane.xlu0 %1305 }
 0x245   :  { %v1309_v44 = vcvt.f32.s32 %v1306_v25 }
 0x247   :  { %v1312_v55 = vadd.s32 %v1311_v51, %v1309_v44 }
 0x249   :  { %v1313_v22 = vrot.slane %v1312_v55, 4 }
 0x24b   :  { %v1314_v49 = vadd.s32 %v1313_v22, %v1312_v55 }
 0x24d   :  { %v1315_v18 = vrot.slane %v1314_v49, 2 }
 0x24f   :  { %v1316_v26 = vadd.s32 %v1315_v18, %v1314_v49 }
 0x251   :  { %v1259_v28 = vpop.xlane.xlu1 %1258  ;;  %v1317_v33 = vrot.slane %v1316_v26, 1 }
 0x252   :  { %v1260_v57 = vrot.slane %v1259_v28, 4 }
 0x253   :  { %v1318_v29 = vadd.s32 %v1317_v33, %v1316_v26 }
 0x254   :  { %v1261_v43 = vadd.f32 %v1260_v57, %v1259_v28 }
 0x256   :  { %v1262_v21 = vrot.slane %v1261_v43, 2 }
 0x258   :  { %v1263_v36 = vadd.f32 %v1262_v21, %v1261_v43 }
 0x25a   :  { %v1264_v6 = vrot.slane %v1263_v36, 1 }
 0x25c   :  { %v1265_v24 = vadd.f32 %v1264_v6, %v1263_v36 }
 0x25e   :  { %1370 = vpush %v1265_v24 }
 0x25f   :  { %1372 = vpush %v1318_v29 }
 0x28f   :  { %s1371_s21 = spop %1370 }
 0x290   :  { %v1267_v27 = vstv %s1371_s21  ;;  %s1373_s22 = spop %1372 }
 0x291   :  { %v1320_v12 = vstv %s1373_s22  ;;  %1269 = vst.msk [vmem:[#allocation8] sm:$0x1] %vm1268_vm9, %v1267_v27 }
 0x292   :  { %1401 = shalt.err (!%p1398_p13)
}
 0x293   :  { %1331 = dma.vmem_to_hbm [thread:$0]  %s1329_s1, 16, %s2488_s5, [#allocation9]   ;;  %1321 = vst.msk [vmem:[#allocation10] sm:$0x1] %vm1268_vm9, %v1320_v12 }
 0x294   :  { %s1410_s23 = scalar_lea.vmem %s1339_s20, 16  ;;  %s1414_s28 = scalar_lea.vmem %s1339_s20, 32 }
 0x295   :  { %p1411_p0 = scmp.ne.s32.totalorder %s1339_s20, %s1410_s23  ;;  %p1415_p1 = scmp.lt.s32.totalorder %s1339_s20, %s1339_s20 }
 0x296   :  { %p1416_p2 = scmp.lt.s32.totalorder %s1414_s28, %s1410_s23 }
 0x298   :  { %p1417_p3 = por %p1416_p2, %p1415_p1 }
 0x29a   :  { %p1418_p4 = pnand %p1417_p3, %p1411_p0 }
 0x29c   :  { %1421 = shalt.err (!%p1418_p4)
}
 0x29d   :  { %1341 = dma.vmem_to_hbm [thread:$0]  %s1339_s20, 16, %s2489_s6, [#allocation11]  }
 0x29e   :  { %1430 = dma.done.wait [#allocation9], 16  }
 0x29f   :  { %1431 = vsyncadd [#allocation9], 4294967280 }
 0x2a0   :  { %1432 = dma.done.wait [#allocation11], 16  }
 0x2a1   :  { %1433 = vsyncadd [#allocation11], 4294967280 }
 0x2a2   :  { %1348 = vsyncpa [#allocation9], 1 }
 0x2a3   :  { %1349 = vsyncpa [#allocation11], 1 }

</bundles_post_ra>
